<compile_context>
chip_gen: v7x
topology: tpu7x:2x2x1
jax: 0.10.0
libtpu: 0.0.40
codegen_flags: <defaults>
</compile_context>

<pallas_src>
import functools

import jax
import jax.numpy as jnp
import numpy as np
from jax import lax
from jax.experimental import pallas as pl
from jax.experimental.pallas import tpu as pltpu

# ---- module constants (synthetic, small; original uno_ai values differ) ----
OBS_VECTOR_SIZE = 64
ACTION_VECTOR_SIZE = 62
DRAW_ACTION_INDEX = 1        # DrawAction().index()
HIDDEN = 128                 # fixed by the module (Linear->128, LSTM(128,128))
LN_EPS = 1e-5                # PyTorch LayerNorm default
HEAD_PAD = 128               # policy (62) + value (1) padded to one 128-lane block
OBS_PAD = 128                # observation padded to a lane-dense block


# --------------------------- Pallas kernel ----------------------------------
def _agent_kernel(
    # inputs
    x_ref,                      # (T*Bp, OBS_PAD) f32  chunk of observations
    h0_ref, c0_ref,             # (Bp, H) f32
    w1_ref,                     # (OBS_PAD, H) bf16
    b1_ref, gamma_ref, beta_ref,  # (1, H) f32
    wfused_ref,                 # (H, 4H + HEAD_PAD) bf16  [W_ih | W_feat_head]
    bfused_ref,                 # (1, 4H + HEAD_PAD) f32   [b_ih+b_hh | b_head+bias_vec]
    whh_ref,                    # (H, 4H) bf16
    whcat_ref,                  # (H, HEAD_PAD) bf16       lstm-output head weight
    # outputs
    head_ref,                   # (T*Bp, HEAD_PAD) f32: [:, :A] logits, [:, A] value
    hn_ref, cn_ref,             # (Bp, H) f32
    # scratch
    h_sc, c_sc,                 # (Bp, H) f32  recurrent carry across chunks
    pg_sc,                      # (T*Bp, 4H) f32  pre-gates for this chunk
    hseq_sc,                    # (T*Bp, H) f32   lstm outputs for this chunk
):
    g = pl.program_id(0)
    B, H = h_sc.shape
    TB = x_ref.shape[0]
    T = TB // B
    bf16 = jnp.bfloat16

    @pl.when(g == 0)
    def _():
        h_sc[...] = h0_ref[...]
        c_sc[...] = c0_ref[...]

    # ---- bulk (time-parallel) work for the whole chunk ----------------------
    # input_proc: Linear(OBS, 128) + Tanh, for all T*Bp rows at once (bf16 MXU).
    z = jnp.tanh(
        jnp.dot(x_ref[...].astype(bf16), w1_ref[...],
                preferred_element_type=jnp.float32)
        + b1_ref[...]
    )                                                        # (TB, H) f32

    # LayerNorm(128) (biased variance, like PyTorch), kept in f32.
    mu = jnp.mean(z, axis=-1, keepdims=True)
    var = jnp.mean((z - mu) * (z - mu), axis=-1, keepdims=True)
    feat = (z - mu) * lax.rsqrt(var + LN_EPS) * gamma_ref[...] + beta_ref[...]

    # Fused matmul: pre-gates for every timestep AND the feat part of the
    # policy/value head in one lane-dense (TB, 640) pass.
    fused = (
        jnp.dot(feat.astype(bf16), wfused_ref[...],
                preferred_element_type=jnp.float32)
        + bfused_ref[...]
    )                                                        # (TB, 4H + 128)
    pg_sc[...] = fused[:, : 4 * H]
    head_ref[...] = fused[:, 4 * H:]                         # feat head partial

    # ---- sequential LSTM recurrence (only h @ W_hh is on the serial path) ---
    # PyTorch gate order: [i, f, g, o]
    def step(t, carry):
        h, c = carry
        row = pl.multiple_of(t * B, B)                       # sublane-aligned
        gates = pg_sc[pl.ds(row, B), :] + jnp.dot(
            h.astype(bf16), whh_ref[...],
            preferred_element_type=jnp.float32)              # (B, 4H)
        i_g = jax.nn.sigmoid(gates[:, 0 * H:1 * H])
        f_g = jax.nn.sigmoid(gates[:, 1 * H:2 * H])
        g_g = jnp.tanh(gates[:, 2 * H:3 * H])
        o_g = jax.nn.sigmoid(gates[:, 3 * H:4 * H])
        c_new = f_g * c + i_g * g_g
        h_new = o_g * jnp.tanh(c_new)
        hseq_sc[pl.ds(row, B), :] = h_new
        return (h_new, c_new)

    # Full unroll only for small static T; bounded unroll otherwise to keep
    # code size / vreg live ranges (and compile time) under control.
    unroll = True if T <= 16 else 8
    h_fin, c_fin = lax.fori_loop(0, T, step, (h_sc[...], c_sc[...]),
                                 unroll=unroll)
    h_sc[...] = h_fin
    c_sc[...] = c_fin

    # ---- bulk lstm-output part of the head (lane-dense 128-wide block) ------
    head_ref[...] += jnp.dot(
        hseq_sc[...].astype(bf16), whcat_ref[...],
        preferred_element_type=jnp.float32)

    @pl.when(g == pl.num_programs(0) - 1)
    def _():
        hn_ref[...] = h_fin
        cn_ref[...] = c_fin


# ------------------------------ wrapper --------------------------------------
def _round_up(x, m):
    return (x + m - 1) // m * m


def _pick_chunk(seq_len, b_pad, budget_bytes=24 << 20):
    """Largest divisor of seq_len whose chunk working set fits the VMEM budget.

    Per timestep-row (f32): x block + head block (double-buffered) plus
    pre-gate and hseq scratch. Keeps the chunk well under v7x's 64 MiB VMEM.
    """
    per_t = b_pad * 4 * (2 * OBS_PAD + 2 * HEAD_PAD + 4 * HIDDEN + HIDDEN)
    t = max(1, min(seq_len, budget_bytes // per_t))
    while seq_len % t:
        t -= 1
    return t


@functools.partial(jax.jit, static_argnames=("chunk_timesteps",))
def agent_forward(inputs, params, h0, c0, *, chunk_timesteps=None):
    """Returns (logits (S,B,A), values (S,B), (h_n (1,B,H), c_n (1,B,H)))."""
    S, B, OBS = inputs.shape
    H, A = HIDDEN, ACTION_VECTOR_SIZE
    f32, bf16 = jnp.float32, jnp.bfloat16

    # Pad batch to a full f32 sublane group so every (B, .) op is unmasked.
    B_pad = _round_up(max(B, 8), 8)
    T = _pick_chunk(S, B_pad) if chunk_timesteps is None else chunk_timesteps
    assert S % T == 0, "seq_len must be divisible by chunk_timesteps"
    n_chunks = S // T
    TB = T * B_pad

    # ---- repack torch-shaped params into kernel layout (trace-time only) ----
    w1 = jnp.pad(params["w1"].T, ((0, OBS_PAD - OBS), (0, 0))).astype(bf16)
    b1 = params["b1"].reshape(1, H).astype(f32)
    gamma = params["gamma"].reshape(1, H).astype(f32)
    beta = params["beta"].reshape(1, H).astype(f32)

    wih_t = params["wih"].T                                   # (H, 4H)
    whh_bf = params["whh"].T.astype(bf16)                     # (H, 4H)
    bg = (params["bih"] + params["bhh"]).reshape(4 * H)

    wp_t = params["wp"].T                                     # (2H, A)
    wv_t = params["wv"].T                                     # (2H, 1)
    bias_vec = jnp.zeros((A,), f32).at[DRAW_ACTION_INDEX].set(-1.0)

    def pad_cols(m):
        return jnp.pad(m, ((0, 0), (0, HEAD_PAD - m.shape[1])))

    wh_cat = pad_cols(jnp.concatenate([wp_t[:H], wv_t[:H]], axis=1)).astype(bf16)
    wf_cat = pad_cols(jnp.concatenate([wp_t[H:], wv_t[H:]], axis=1))
    w_fused = jnp.concatenate([wih_t, wf_cat], axis=1).astype(bf16)   # (H, 640)

    bcat = jnp.concatenate([params["bp"] + bias_vec, params["bv"]])
    bcat = jnp.pad(bcat, (0, HEAD_PAD - bcat.shape[0]))
    b_fused = jnp.concatenate([bg, bcat]).reshape(1, 4 * H + HEAD_PAD).astype(f32)

    # ---- pad inputs / states (batch -> B_pad, obs -> OBS_PAD) ----------------
    x_pad = jnp.pad(inputs.astype(f32),
                    ((0, 0), (0, B_pad - B), (0, OBS_PAD - OBS)))
    x_flat = x_pad.reshape(S * B_pad, OBS_PAD)
    h0f = jnp.pad(h0.reshape(B, H).astype(f32), ((0, B_pad - B), (0, 0)))
    c0f = jnp.pad(c0.reshape(B, H).astype(f32), ((0, B_pad - B), (0, 0)))

    full = lambda *shape: pl.BlockSpec(shape, lambda g: (0,) * len(shape))

    # NOTE: on v7x with a large real batch, a leading "parallel" batch-block
    # grid axis would shard the recurrence across the two TensorCores; omitted
    # here since the test batch is tiny.
    grid_spec = pltpu.PrefetchScalarGridSpec(
        num_scalar_prefetch=0,
        grid=(n_chunks,),
        in_specs=[
            pl.BlockSpec((TB, OBS_PAD), lambda g: (g, 0)),    # x chunk
            full(B_pad, H), full(B_pad, H),                   # h0, c0
            full(OBS_PAD, H),                                 # w1 (bf16)
            full(1, H), full(1, H), full(1, H),               # b1, gamma, beta
            full(H, 4 * H + HEAD_PAD),                        # fused W (bf16)
            full(1, 4 * H + HEAD_PAD),                        # fused bias
            full(H, 4 * H),                                   # whh (bf16)
            full(H, HEAD_PAD),                                # wh_cat (bf16)
        ],
        out_specs=[
            pl.BlockSpec((TB, HEAD_PAD), lambda g: (g, 0)),   # head chunk
            full(B_pad, H),                                   # h_n
            full(B_pad, H),                                   # c_n
        ],
        scratch_shapes=[
            pltpu.VMEM((B_pad, H), f32),                      # h carry
            pltpu.VMEM((B_pad, H), f32),                      # c carry
            pltpu.VMEM((TB, 4 * H), f32),                     # pre-gates (2-D)
            pltpu.VMEM((TB, H), f32),                         # h sequence (2-D)
        ],
    )

    head, h_n, c_n = pl.pallas_call(
        _agent_kernel,
        out_shape=(
            jax.ShapeDtypeStruct((S * B_pad, HEAD_PAD), f32),
            jax.ShapeDtypeStruct((B_pad, H), f32),
            jax.ShapeDtypeStruct((B_pad, H), f32),
        ),
        grid_spec=grid_spec,
        compiler_params=pltpu.CompilerParams(
            dimension_semantics=("arbitrary",),               # LSTM recurrence
            vmem_limit_bytes=32 * 1024 * 1024,
        ),
    )(
        x_flat, h0f, c0f,
        w1, b1, gamma, beta,
        w_fused, b_fused, whh_bf, wh_cat,
    )

    head = head.reshape(S, B_pad, HEAD_PAD)
    logits = head[:, :B, :A]
    values = head[:, :B, A]
    return logits, values, (h_n[:B][None], c_n[:B][None])


# --------------------------- pure-JAX reference -------------------------------
def agent_forward_ref(inputs, params, h0, c0):
    S, B, OBS = inputs.shape
    H, A = HIDDEN, ACTION_VECTOR_SIZE
    flat_in = inputs.reshape(-1, OBS)
    z = jnp.tanh(flat_in @ params["w1"].T + params["b1"])
    mu = z.mean(-1, keepdims=True)
    var = ((z - mu) ** 2).mean(-1, keepdims=True)
    feat = (z - mu) / jnp.sqrt(var + LN_EPS) * params["gamma"] + params["beta"]
    feat_seq = feat.reshape(S, B, H)

    def step(carry, xt):
        h, c = carry
        gates = xt @ params["wih"].T + params["bih"] + h @ params["whh"].T + params["bhh"]
        i, f, g, o = jnp.split(gates, 4, axis=-1)
        i, f, o = jax.nn.sigmoid(i), jax.nn.sigmoid(f), jax.nn.sigmoid(o)
        g = jnp.tanh(g)
        c2 = f * c + i * g
        h2 = o * jnp.tanh(c2)
        return (h2, c2), h2

    (h_n, c_n), outs = jax.lax.scan(step, (h0[0], c0[0]), feat_seq)
    flat_out = jnp.concatenate([outs.reshape(-1, H), feat], axis=-1)
    bias_vec = jnp.zeros((A,), jnp.float32).at[DRAW_ACTION_INDEX].set(-1.0)
    logits = (flat_out @ params["wp"].T + params["bp"] + bias_vec).reshape(S, B, A)
    values = (flat_out @ params["wv"].T + params["bv"]).reshape(S, B)
    return logits, values, (h_n[None], c_n[None])


# ------------------------------ params ---------------------------------------
def init_params(key):
    # Torch-shaped params; deterministic random init.
    # NOTE: Agent.__init__ zero-fills policy/value params; we use small random
    # values here so the head matmuls in the kernel are actually exercised.
    ks = jax.random.split(key, 8)
    n = lambda k, s, sc: (sc * jax.random.normal(k, s)).astype(jnp.float32)
    H, A, OBS = HIDDEN, ACTION_VECTOR_SIZE, OBS_VECTOR_SIZE
    return {
        "w1": n(ks[0], (H, OBS), 0.1), "b1": n(ks[1], (H,), 0.1),
        "gamma": jnp.ones((H,), jnp.float32), "beta": jnp.zeros((H,), jnp.float32),
        "wih": n(ks[2], (4 * H, H), 0.05), "whh": n(ks[3], (4 * H, H), 0.05),
        "bih": n(ks[4], (4 * H,), 0.05), "bhh": n(ks[5], (4 * H,), 0.05),
        "wp": n(ks[6], (A, 2 * H), 0.05), "bp": jnp.zeros((A,), jnp.float32),
        "wv": n(ks[7], (1, 2 * H), 0.05), "bv": jnp.zeros((1,), jnp.float32),
    }


# TODO(synk): Agent.step / sample_softmax are host-side game-loop + numpy RNG
# sampling, not tensor compute; they are intentionally not ported to Pallas.

if __name__ == "__main__":
    key = jax.random.PRNGKey(0)
    kx, kp = jax.random.split(key)

    SEQ, BATCH = 8, 2
    inputs = jax.random.normal(kx, (SEQ, BATCH, OBS_VECTOR_SIZE), jnp.float32)
    params = init_params(kp)
    h0 = jnp.zeros((1, BATCH, HIDDEN), jnp.float32)   # states=None -> zeros
    c0 = jnp.zeros((1, BATCH, HIDDEN), jnp.float32)

    logits, values, (h_n, c_n) = agent_forward(inputs, params, h0, c0)
    jax.block_until_ready((logits, values, h_n, c_n))

    rl, rv, (rh, rc) = agent_forward_ref(inputs, params, h0, c0)
    # bf16 MXU operands -> slightly looser tolerances than the pure-f32 version.
    np.testing.assert_allclose(np.asarray(logits), np.asarray(rl), rtol=2e-2, atol=2e-2)
    np.testing.assert_allclose(np.asarray(values), np.asarray(rv), rtol=2e-2, atol=2e-2)
    np.testing.assert_allclose(np.asarray(h_n), np.asarray(rh), rtol=2e-2, atol=2e-2)
    np.testing.assert_allclose(np.asarray(c_n), np.asarray(rc), rtol=2e-2, atol=2e-2)

    assert logits.shape == (SEQ, BATCH, ACTION_VECTOR_SIZE)
    assert values.shape == (SEQ, BATCH)
    assert h_n.shape == (1, BATCH, HIDDEN) and c_n.shape == (1, BATCH, HIDDEN)
    print("KERNEL_OK")
</pallas_src>

<mosaic_0001>
module attributes {stable_mosaic.version = 11 : i64} {
  func.func @_agent_kernel(%arg0: i32, %arg1: memref<64x128xf32, #tpu.memory_space<vmem>>, %arg2: memref<8x128xf32, #tpu.memory_space<vmem>>, %arg3: memref<8x128xf32, #tpu.memory_space<vmem>>, %arg4: memref<128x128xbf16, #tpu.memory_space<vmem>>, %arg5: memref<1x128xf32, #tpu.memory_space<vmem>>, %arg6: memref<1x128xf32, #tpu.memory_space<vmem>>, %arg7: memref<1x128xf32, #tpu.memory_space<vmem>>, %arg8: memref<128x640xbf16, #tpu.memory_space<vmem>>, %arg9: memref<1x640xf32, #tpu.memory_space<vmem>>, %arg10: memref<128x512xbf16, #tpu.memory_space<vmem>>, %arg11: memref<128x128xbf16, #tpu.memory_space<vmem>>, %arg12: memref<64x128xf32, #tpu.memory_space<vmem>>, %arg13: memref<8x128xf32, #tpu.memory_space<vmem>>, %arg14: memref<8x128xf32, #tpu.memory_space<vmem>>, %arg15: memref<8x128xf32, #tpu.memory_space<vmem>>, %arg16: memref<8x128xf32, #tpu.memory_space<vmem>>, %arg17: memref<64x512xf32, #tpu.memory_space<vmem>>, %arg18: memref<64x128xf32, #tpu.memory_space<vmem>>) attributes {dimension_semantics = [#tpu.dimension_semantics<arbitrary>], iteration_bounds = array<i64: 1>, scalar_prefetch = 0 : i64, scratch_operands = 4 : i64, tpu.core_type = #tpu.core_type<tc>, window_params = [{transform_indices = @transform_0, window_bounds = array<i64: 64, 128>}, {pipeline_mode = #tpu.pipeline_mode<synchronous>, transform_indices = @transform_1, window_bounds = array<i64: 8, 128>}, {pipeline_mode = #tpu.pipeline_mode<synchronous>, transform_indices = @transform_2, window_bounds = array<i64: 8, 128>}, {pipeline_mode = #tpu.pipeline_mode<synchronous>, transform_indices = @transform_3, window_bounds = array<i64: 128, 128>}, {pipeline_mode = #tpu.pipeline_mode<synchronous>, transform_indices = @transform_4, window_bounds = array<i64: 1, 128>}, {pipeline_mode = #tpu.pipeline_mode<synchronous>, transform_indices = @transform_5, window_bounds = array<i64: 1, 128>}, {pipeline_mode = #tpu.pipeline_mode<synchronous>, transform_indices = @transform_6, window_bounds = array<i64: 1, 128>}, {pipeline_mode = #tpu.pipeline_mode<synchronous>, transform_indices = @transform_7, window_bounds = array<i64: 128, 640>}, {pipeline_mode = #tpu.pipeline_mode<synchronous>, transform_indices = @transform_8, window_bounds = array<i64: 1, 640>}, {pipeline_mode = #tpu.pipeline_mode<synchronous>, transform_indices = @transform_9, window_bounds = array<i64: 128, 512>}, {pipeline_mode = #tpu.pipeline_mode<synchronous>, transform_indices = @transform_10, window_bounds = array<i64: 128, 128>}, {transform_indices = @transform_11, window_bounds = array<i64: 64, 128>}, {pipeline_mode = #tpu.pipeline_mode<synchronous>, transform_indices = @transform_12, window_bounds = array<i64: 8, 128>}, {pipeline_mode = #tpu.pipeline_mode<synchronous>, transform_indices = @transform_13, window_bounds = array<i64: 8, 128>}]} {
    %c0_i32 = arith.constant 0 : i32
    %0 = arith.cmpi eq, %arg0, %c0_i32 : i32
    %1 = arith.extui %0 : i1 to i32
    %c0_i32_0 = arith.constant 0 : i32
    %2 = arith.cmpi ne, %1, %c0_i32_0 : i32
    scf.if %2 {
      %c0_116 = arith.constant 0 : index
      %c0_117 = arith.constant 0 : index
      %341 = vector.load %arg2[%c0_116, %c0_117] : memref<8x128xf32, #tpu.memory_space<vmem>>, vector<8x128xf32>
      %c0_118 = arith.constant 0 : index
      %c0_119 = arith.constant 0 : index
      %342 = vector.load %arg15[%c0_118, %c0_119] : memref<8x128xf32, #tpu.memory_space<vmem>>, vector<8x128xf32>
      tpu.vector_store %arg15[%c0_118, %c0_119], %341 {strides = array<i32>} : memref<8x128xf32, #tpu.memory_space<vmem>>, vector<8x128xf32>,
      %c0_120 = arith.constant 0 : index
      %c0_121 = arith.constant 0 : index
      %343 = vector.load %arg3[%c0_120, %c0_121] : memref<8x128xf32, #tpu.memory_space<vmem>>, vector<8x128xf32>
      %c0_122 = arith.constant 0 : index
      %c0_123 = arith.constant 0 : index
      %344 = vector.load %arg16[%c0_122, %c0_123] : memref<8x128xf32, #tpu.memory_space<vmem>>, vector<8x128xf32>
      tpu.vector_store %arg16[%c0_122, %c0_123], %343 {strides = array<i32>} : memref<8x128xf32, #tpu.memory_space<vmem>>, vector<8x128xf32>,
    } else {
    }
    %c0 = arith.constant 0 : index
    %c0_1 = arith.constant 0 : index
    %3 = vector.load %arg1[%c0, %c0_1] : memref<64x128xf32, #tpu.memory_space<vmem>>, vector<64x128xf32>
    %4 = arith.truncf %3 : vector<64x128xf32> to vector<64x128xbf16>
    %c0_2 = arith.constant 0 : index
    %c0_3 = arith.constant 0 : index
    %5 = vector.load %arg4[%c0_2, %c0_3] : memref<128x128xbf16, #tpu.memory_space<vmem>>, vector<128x128xbf16>
    %cst = arith.constant dense<0.000000e+00> : vector<64x128xf32>
    %6 = tpu.matmul %4, %5, %cst {dimension_numbers = #tpu.dot_dimension_numbers<[1], [0], [0], [1], [0, 0, 1, 1], [], []>} : vector<64x128xbf16>, vector<128x128xbf16>, vector<64x128xf32> -> vector<64x128xf32>
    %c0_4 = arith.constant 0 : index
    %c0_5 = arith.constant 0 : index
    %7 = vector.load %arg5[%c0_4, %c0_5] : memref<1x128xf32, #tpu.memory_space<vmem>>, vector<1x128xf32>
    %8 = vector.broadcast %7 : vector<1x128xf32> to vector<64x128xf32>
    %9 = arith.addf %6, %8 : vector<64x128xf32>
    %10 = math.tanh %9 : vector<64x128xf32>
    %cst_6 = arith.constant dense<0.000000e+00> : vector<64xf32>
    %11 = vector.multi_reduction <add>, %10, %cst_6 [1] : vector<64x128xf32> to vector<64xf32>
    %12 = vector.shape_cast %11 : vector<64xf32> to vector<64x1xf32>
    %cst_7 = arith.constant 1.280000e+02 : f32
    %13 = vector.broadcast %cst_7 : f32 to vector<64x1xf32>
    %14 = arith.divf %12, %13 : vector<64x1xf32>
    %15 = vector.broadcast %14 : vector<64x1xf32> to vector<64x128xf32>
    %16 = arith.subf %10, %15 : vector<64x128xf32>
    %17 = vector.broadcast %14 : vector<64x1xf32> to vector<64x128xf32>
    %18 = arith.subf %10, %17 : vector<64x128xf32>
    %19 = arith.mulf %16, %18 : vector<64x128xf32>
    %cst_8 = arith.constant dense<0.000000e+00> : vector<64xf32>
    %20 = vector.multi_reduction <add>, %19, %cst_8 [1] : vector<64x128xf32> to vector<64xf32>
    %21 = vector.shape_cast %20 : vector<64xf32> to vector<64x1xf32>
    %cst_9 = arith.constant 1.280000e+02 : f32
    %22 = vector.broadcast %cst_9 : f32 to vector<64x1xf32>
    %23 = arith.divf %21, %22 : vector<64x1xf32>
    %24 = vector.broadcast %14 : vector<64x1xf32> to vector<64x128xf32>
    %25 = arith.subf %10, %24 : vector<64x128xf32>
    %cst_10 = arith.constant 9.99999974E-6 : f32
    %26 = vector.broadcast %cst_10 : f32 to vector<64x1xf32>
    %27 = arith.addf %23, %26 : vector<64x1xf32>
    %28 = math.rsqrt %27 : vector<64x1xf32>
    %29 = vector.broadcast %28 : vector<64x1xf32> to vector<64x128xf32>
    %30 = arith.mulf %25, %29 : vector<64x128xf32>
    %c0_11 = arith.constant 0 : index
    %c0_12 = arith.constant 0 : index
    %31 = vector.load %arg6[%c0_11, %c0_12] : memref<1x128xf32, #tpu.memory_space<vmem>>, vector<1x128xf32>
    %32 = vector.broadcast %31 : vector<1x128xf32> to vector<64x128xf32>
    %33 = arith.mulf %30, %32 : vector<64x128xf32>
    %c0_13 = arith.constant 0 : index
    %c0_14 = arith.constant 0 : index
    %34 = vector.load %arg7[%c0_13, %c0_14] : memref<1x128xf32, #tpu.memory_space<vmem>>, vector<1x128xf32>
    %35 = vector.broadcast %34 : vector<1x128xf32> to vector<64x128xf32>
    %36 = arith.addf %33, %35 : vector<64x128xf32>
    %37 = arith.truncf %36 : vector<64x128xf32> to vector<64x128xbf16>
    %c0_15 = arith.constant 0 : index
    %c0_16 = arith.constant 0 : index
    %38 = vector.load %arg8[%c0_15, %c0_16] : memref<128x640xbf16, #tpu.memory_space<vmem>>, vector<128x640xbf16>
    %cst_17 = arith.constant dense<0.000000e+00> : vector<64x640xf32>
    %39 = tpu.matmul %37, %38, %cst_17 {dimension_numbers = #tpu.dot_dimension_numbers<[1], [0], [0], [1], [0, 0, 1, 1], [], []>} : vector<64x128xbf16>, vector<128x640xbf16>, vector<64x640xf32> -> vector<64x640xf32>
    %c0_18 = arith.constant 0 : index
    %c0_19 = arith.constant 0 : index
    %40 = vector.load %arg9[%c0_18, %c0_19] : memref<1x640xf32, #tpu.memory_space<vmem>>, vector<1x640xf32>
    %41 = vector.broadcast %40 : vector<1x640xf32> to vector<64x640xf32>
    %42 = arith.addf %39, %41 : vector<64x640xf32>
    %43 = vector.extract_strided_slice %42 {offsets = [0, 0], sizes = [64, 512], strides = [1, 1]} : vector<64x640xf32> to vector<64x512xf32>
    %c0_20 = arith.constant 0 : index
    %c0_21 = arith.constant 0 : index
    %44 = vector.load %arg17[%c0_20, %c0_21] : memref<64x512xf32, #tpu.memory_space<vmem>>, vector<64x512xf32>
    tpu.vector_store %arg17[%c0_20, %c0_21], %43 {strides = array<i32>} : memref<64x512xf32, #tpu.memory_space<vmem>>, vector<64x512xf32>,
    %45 = vector.extract_strided_slice %42 {offsets = [0, 512], sizes = [64, 128], strides = [1, 1]} : vector<64x640xf32> to vector<64x128xf32>
    %c0_22 = arith.constant 0 : index
    %c0_23 = arith.constant 0 : index
    %46 = vector.load %arg12[%c0_22, %c0_23] : memref<64x128xf32, #tpu.memory_space<vmem>>, vector<64x128xf32>
    tpu.vector_store %arg12[%c0_22, %c0_23], %45 {strides = array<i32>} : memref<64x128xf32, #tpu.memory_space<vmem>>, vector<64x128xf32>,
    %c0_24 = arith.constant 0 : index
    %c0_25 = arith.constant 0 : index
    %47 = vector.load %arg15[%c0_24, %c0_25] : memref<8x128xf32, #tpu.memory_space<vmem>>, vector<8x128xf32>
    %c0_26 = arith.constant 0 : index
    %c0_27 = arith.constant 0 : index
    %48 = vector.load %arg16[%c0_26, %c0_27] : memref<8x128xf32, #tpu.memory_space<vmem>>, vector<8x128xf32>
    %c0_i32_28 = arith.constant 0 : i32
    %c8_i32 = arith.constant 8 : i32
    %49 = arith.muli %c0_i32_28, %c8_i32 : i32
    %50 = tpu.assume_multiple %49, 8 : i32
    %51 = arith.index_cast %50 : i32 to index
    %c0_29 = arith.constant 0 : index
    %52 = vector.load %arg17[%51, %c0_29] : memref<64x512xf32, #tpu.memory_space<vmem>>, vector<8x512xf32>
    %53 = arith.truncf %47 : vector<8x128xf32> to vector<8x128xbf16>
    %c0_30 = arith.constant 0 : index
    %c0_31 = arith.constant 0 : index
    %54 = vector.load %arg10[%c0_30, %c0_31] : memref<128x512xbf16, #tpu.memory_space<vmem>>, vector<128x512xbf16>
    %cst_32 = arith.constant dense<0.000000e+00> : vector<8x512xf32>
    %55 = tpu.matmul %53, %54, %cst_32 {dimension_numbers = #tpu.dot_dimension_numbers<[1], [0], [0], [1], [0, 0, 1, 1], [], []>} : vector<8x128xbf16>, vector<128x512xbf16>, vector<8x512xf32> -> vector<8x512xf32>
    %56 = arith.addf %52, %55 : vector<8x512xf32>
    %57 = vector.extract_strided_slice %56 {offsets = [0, 0], sizes = [8, 128], strides = [1, 1]} : vector<8x512xf32> to vector<8x128xf32>
    %58 = arith.negf %57 : vector<8x128xf32>
    %59 = math.exp %58 : vector<8x128xf32>
    %cst_33 = arith.constant 1.000000e+00 : f32
    %60 = vector.broadcast %cst_33 : f32 to vector<8x128xf32>
    %61 = arith.addf %60, %59 : vector<8x128xf32>
    %62 = arith.divf %60, %61 : vector<8x128xf32>
    %63 = vector.extract_strided_slice %56 {offsets = [0, 128], sizes = [8, 128], strides = [1, 1]} : vector<8x512xf32> to vector<8x128xf32>
    %64 = arith.negf %63 : vector<8x128xf32>
    %65 = math.exp %64 : vector<8x128xf32>
    %cst_34 = arith.constant 1.000000e+00 : f32
    %66 = vector.broadcast %cst_34 : f32 to vector<8x128xf32>
    %67 = arith.addf %66, %65 : vector<8x128xf32>
    %68 = arith.divf %66, %67 : vector<8x128xf32>
    %69 = vector.extract_strided_slice %56 {offsets = [0, 256], sizes = [8, 128], strides = [1, 1]} : vector<8x512xf32> to vector<8x128xf32>
    %70 = math.tanh %69 : vector<8x128xf32>
    %71 = vector.extract_strided_slice %56 {offsets = [0, 384], sizes = [8, 128], strides = [1, 1]} : vector<8x512xf32> to vector<8x128xf32>
    %72 = arith.negf %71 : vector<8x128xf32>
    %73 = math.exp %72 : vector<8x128xf32>
    %cst_35 = arith.constant 1.000000e+00 : f32
    %74 = vector.broadcast %cst_35 : f32 to vector<8x128xf32>
    %75 = arith.addf %74, %73 : vector<8x128xf32>
    %76 = arith.divf %74, %75 : vector<8x128xf32>
    %77 = arith.mulf %68, %48 : vector<8x128xf32>
    %78 = arith.mulf %62, %70 : vector<8x128xf32>
    %79 = arith.addf %77, %78 : vector<8x128xf32>
    %80 = math.tanh %79 : vector<8x128xf32>
    %81 = arith.mulf %76, %80 : vector<8x128xf32>
    %82 = arith.index_cast %50 : i32 to index
    %c0_36 = arith.constant 0 : index
    %83 = vector.load %arg18[%82, %c0_36] : memref<64x128xf32, #tpu.memory_space<vmem>>, vector<8x128xf32>
    tpu.vector_store %arg18[%82, %c0_36], %81 {strides = array<i32>} : memref<64x128xf32, #tpu.memory_space<vmem>>, vector<8x128xf32>,
    %c1_i32 = arith.constant 1 : i32
    %c8_i32_37 = arith.constant 8 : i32
    %84 = arith.muli %c1_i32, %c8_i32_37 : i32
    %85 = tpu.assume_multiple %84, 8 : i32
    %86 = arith.index_cast %85 : i32 to index
    %c0_38 = arith.constant 0 : index
    %87 = vector.load %arg17[%86, %c0_38] : memref<64x512xf32, #tpu.memory_space<vmem>>, vector<8x512xf32>
    %88 = arith.truncf %81 : vector<8x128xf32> to vector<8x128xbf16>
    %c0_39 = arith.constant 0 : index
    %c0_40 = arith.constant 0 : index
    %89 = vector.load %arg10[%c0_39, %c0_40] : memref<128x512xbf16, #tpu.memory_space<vmem>>, vector<128x512xbf16>
    %cst_41 = arith.constant dense<0.000000e+00> : vector<8x512xf32>
    %90 = tpu.matmul %88, %89, %cst_41 {dimension_numbers = #tpu.dot_dimension_numbers<[1], [0], [0], [1], [0, 0, 1, 1], [], []>} : vector<8x128xbf16>, vector<128x512xbf16>, vector<8x512xf32> -> vector<8x512xf32>
    %91 = arith.addf %87, %90 : vector<8x512xf32>
    %92 = vector.extract_strided_slice %91 {offsets = [0, 0], sizes = [8, 128], strides = [1, 1]} : vector<8x512xf32> to vector<8x128xf32>
    %93 = arith.negf %92 : vector<8x128xf32>
    %94 = math.exp %93 : vector<8x128xf32>
    %cst_42 = arith.constant 1.000000e+00 : f32
    %95 = vector.broadcast %cst_42 : f32 to vector<8x128xf32>
    %96 = arith.addf %95, %94 : vector<8x128xf32>
    %97 = arith.divf %95, %96 : vector<8x128xf32>
    %98 = vector.extract_strided_slice %91 {offsets = [0, 128], sizes = [8, 128], strides = [1, 1]} : vector<8x512xf32> to vector<8x128xf32>
    %99 = arith.negf %98 : vector<8x128xf32>
    %100 = math.exp %99 : vector<8x128xf32>
    %cst_43 = arith.constant 1.000000e+00 : f32
    %101 = vector.broadcast %cst_43 : f32 to vector<8x128xf32>
    %102 = arith.addf %101, %100 : vector<8x128xf32>
    %103 = arith.divf %101, %102 : vector<8x128xf32>
    %104 = vector.extract_strided_slice %91 {offsets = [0, 256], sizes = [8, 128], strides = [1, 1]} : vector<8x512xf32> to vector<8x128xf32>
    %105 = math.tanh %104 : vector<8x128xf32>
    %106 = vector.extract_strided_slice %91 {offsets = [0, 384], sizes = [8, 128], strides = [1, 1]} : vector<8x512xf32> to vector<8x128xf32>
    %107 = arith.negf %106 : vector<8x128xf32>
    %108 = math.exp %107 : vector<8x128xf32>
    %cst_44 = arith.constant 1.000000e+00 : f32
    %109 = vector.broadcast %cst_44 : f32 to vector<8x128xf32>
    %110 = arith.addf %109, %108 : vector<8x128xf32>
    %111 = arith.divf %109, %110 : vector<8x128xf32>
    %112 = arith.mulf %103, %79 : vector<8x128xf32>
    %113 = arith.mulf %97, %105 : vector<8x128xf32>
    %114 = arith.addf %112, %113 : vector<8x128xf32>
    %115 = math.tanh %114 : vector<8x128xf32>
    %116 = arith.mulf %111, %115 : vector<8x128xf32>
    %117 = arith.index_cast %85 : i32 to index
    %c0_45 = arith.constant 0 : index
    %118 = vector.load %arg18[%117, %c0_45] : memref<64x128xf32, #tpu.memory_space<vmem>>, vector<8x128xf32>
    tpu.vector_store %arg18[%117, %c0_45], %116 {strides = array<i32>} : memref<64x128xf32, #tpu.memory_space<vmem>>, vector<8x128xf32>,
    %c2_i32 = arith.constant 2 : i32
    %c8_i32_46 = arith.constant 8 : i32
    %119 = arith.muli %c2_i32, %c8_i32_46 : i32
    %120 = tpu.assume_multiple %119, 8 : i32
    %121 = arith.index_cast %120 : i32 to index
    %c0_47 = arith.constant 0 : index
    %122 = vector.load %arg17[%121, %c0_47] : memref<64x512xf32, #tpu.memory_space<vmem>>, vector<8x512xf32>
    %123 = arith.truncf %116 : vector<8x128xf32> to vector<8x128xbf16>
    %c0_48 = arith.constant 0 : index
    %c0_49 = arith.constant 0 : index
    %124 = vector.load %arg10[%c0_48, %c0_49] : memref<128x512xbf16, #tpu.memory_space<vmem>>, vector<128x512xbf16>
    %cst_50 = arith.constant dense<0.000000e+00> : vector<8x512xf32>
    %125 = tpu.matmul %123, %124, %cst_50 {dimension_numbers = #tpu.dot_dimension_numbers<[1], [0], [0], [1], [0, 0, 1, 1], [], []>} : vector<8x128xbf16>, vector<128x512xbf16>, vector<8x512xf32> -> vector<8x512xf32>
    %126 = arith.addf %122, %125 : vector<8x512xf32>
    %127 = vector.extract_strided_slice %126 {offsets = [0, 0], sizes = [8, 128], strides = [1, 1]} : vector<8x512xf32> to vector<8x128xf32>
    %128 = arith.negf %127 : vector<8x128xf32>
    %129 = math.exp %128 : vector<8x128xf32>
    %cst_51 = arith.constant 1.000000e+00 : f32
    %130 = vector.broadcast %cst_51 : f32 to vector<8x128xf32>
    %131 = arith.addf %130, %129 : vector<8x128xf32>
    %132 = arith.divf %130, %131 : vector<8x128xf32>
    %133 = vector.extract_strided_slice %126 {offsets = [0, 128], sizes = [8, 128], strides = [1, 1]} : vector<8x512xf32> to vector<8x128xf32>
    %134 = arith.negf %133 : vector<8x128xf32>
    %135 = math.exp %134 : vector<8x128xf32>
    %cst_52 = arith.constant 1.000000e+00 : f32
    %136 = vector.broadcast %cst_52 : f32 to vector<8x128xf32>
    %137 = arith.addf %136, %135 : vector<8x128xf32>
    %138 = arith.divf %136, %137 : vector<8x128xf32>
    %139 = vector.extract_strided_slice %126 {offsets = [0, 256], sizes = [8, 128], strides = [1, 1]} : vector<8x512xf32> to vector<8x128xf32>
    %140 = math.tanh %139 : vector<8x128xf32>
    %141 = vector.extract_strided_slice %126 {offsets = [0, 384], sizes = [8, 128], strides = [1, 1]} : vector<8x512xf32> to vector<8x128xf32>
    %142 = arith.negf %141 : vector<8x128xf32>
    %143 = math.exp %142 : vector<8x128xf32>
    %cst_53 = arith.constant 1.000000e+00 : f32
    %144 = vector.broadcast %cst_53 : f32 to vector<8x128xf32>
    %145 = arith.addf %144, %143 : vector<8x128xf32>
    %146 = arith.divf %144, %145 : vector<8x128xf32>
    %147 = arith.mulf %138, %114 : vector<8x128xf32>
    %148 = arith.mulf %132, %140 : vector<8x128xf32>
    %149 = arith.addf %147, %148 : vector<8x128xf32>
    %150 = math.tanh %149 : vector<8x128xf32>
    %151 = arith.mulf %146, %150 : vector<8x128xf32>
    %152 = arith.index_cast %120 : i32 to index
    %c0_54 = arith.constant 0 : index
    %153 = vector.load %arg18[%152, %c0_54] : memref<64x128xf32, #tpu.memory_space<vmem>>, vector<8x128xf32>
    tpu.vector_store %arg18[%152, %c0_54], %151 {strides = array<i32>} : memref<64x128xf32, #tpu.memory_space<vmem>>, vector<8x128xf32>,
    %c3_i32 = arith.constant 3 : i32
    %c8_i32_55 = arith.constant 8 : i32
    %154 = arith.muli %c3_i32, %c8_i32_55 : i32
    %155 = tpu.assume_multiple %154, 8 : i32
    %156 = arith.index_cast %155 : i32 to index
    %c0_56 = arith.constant 0 : index
    %157 = vector.load %arg17[%156, %c0_56] : memref<64x512xf32, #tpu.memory_space<vmem>>, vector<8x512xf32>
    %158 = arith.truncf %151 : vector<8x128xf32> to vector<8x128xbf16>
    %c0_57 = arith.constant 0 : index
    %c0_58 = arith.constant 0 : index
    %159 = vector.load %arg10[%c0_57, %c0_58] : memref<128x512xbf16, #tpu.memory_space<vmem>>, vector<128x512xbf16>
    %cst_59 = arith.constant dense<0.000000e+00> : vector<8x512xf32>
    %160 = tpu.matmul %158, %159, %cst_59 {dimension_numbers = #tpu.dot_dimension_numbers<[1], [0], [0], [1], [0, 0, 1, 1], [], []>} : vector<8x128xbf16>, vector<128x512xbf16>, vector<8x512xf32> -> vector<8x512xf32>
    %161 = arith.addf %157, %160 : vector<8x512xf32>
    %162 = vector.extract_strided_slice %161 {offsets = [0, 0], sizes = [8, 128], strides = [1, 1]} : vector<8x512xf32> to vector<8x128xf32>
    %163 = arith.negf %162 : vector<8x128xf32>
    %164 = math.exp %163 : vector<8x128xf32>
    %cst_60 = arith.constant 1.000000e+00 : f32
    %165 = vector.broadcast %cst_60 : f32 to vector<8x128xf32>
    %166 = arith.addf %165, %164 : vector<8x128xf32>
    %167 = arith.divf %165, %166 : vector<8x128xf32>
    %168 = vector.extract_strided_slice %161 {offsets = [0, 128], sizes = [8, 128], strides = [1, 1]} : vector<8x512xf32> to vector<8x128xf32>
    %169 = arith.negf %168 : vector<8x128xf32>
    %170 = math.exp %169 : vector<8x128xf32>
    %cst_61 = arith.constant 1.000000e+00 : f32
    %171 = vector.broadcast %cst_61 : f32 to vector<8x128xf32>
    %172 = arith.addf %171, %170 : vector<8x128xf32>
    %173 = arith.divf %171, %172 : vector<8x128xf32>
    %174 = vector.extract_strided_slice %161 {offsets = [0, 256], sizes = [8, 128], strides = [1, 1]} : vector<8x512xf32> to vector<8x128xf32>
    %175 = math.tanh %174 : vector<8x128xf32>
    %176 = vector.extract_strided_slice %161 {offsets = [0, 384], sizes = [8, 128], strides = [1, 1]} : vector<8x512xf32> to vector<8x128xf32>
    %177 = arith.negf %176 : vector<8x128xf32>
    %178 = math.exp %177 : vector<8x128xf32>
    %cst_62 = arith.constant 1.000000e+00 : f32
    %179 = vector.broadcast %cst_62 : f32 to vector<8x128xf32>
    %180 = arith.addf %179, %178 : vector<8x128xf32>
    %181 = arith.divf %179, %180 : vector<8x128xf32>
    %182 = arith.mulf %173, %149 : vector<8x128xf32>
    %183 = arith.mulf %167, %175 : vector<8x128xf32>
    %184 = arith.addf %182, %183 : vector<8x128xf32>
    %185 = math.tanh %184 : vector<8x128xf32>
    %186 = arith.mulf %181, %185 : vector<8x128xf32>
    %187 = arith.index_cast %155 : i32 to index
    %c0_63 = arith.constant 0 : index
    %188 = vector.load %arg18[%187, %c0_63] : memref<64x128xf32, #tpu.memory_space<vmem>>, vector<8x128xf32>
    tpu.vector_store %arg18[%187, %c0_63], %186 {strides = array<i32>} : memref<64x128xf32, #tpu.memory_space<vmem>>, vector<8x128xf32>,
    %c4_i32 = arith.constant 4 : i32
    %c8_i32_64 = arith.constant 8 : i32
    %189 = arith.muli %c4_i32, %c8_i32_64 : i32
    %190 = tpu.assume_multiple %189, 8 : i32
    %191 = arith.index_cast %190 : i32 to index
    %c0_65 = arith.constant 0 : index
    %192 = vector.load %arg17[%191, %c0_65] : memref<64x512xf32, #tpu.memory_space<vmem>>, vector<8x512xf32>
    %193 = arith.truncf %186 : vector<8x128xf32> to vector<8x128xbf16>
    %c0_66 = arith.constant 0 : index
    %c0_67 = arith.constant 0 : index
    %194 = vector.load %arg10[%c0_66, %c0_67] : memref<128x512xbf16, #tpu.memory_space<vmem>>, vector<128x512xbf16>
    %cst_68 = arith.constant dense<0.000000e+00> : vector<8x512xf32>
    %195 = tpu.matmul %193, %194, %cst_68 {dimension_numbers = #tpu.dot_dimension_numbers<[1], [0], [0], [1], [0, 0, 1, 1], [], []>} : vector<8x128xbf16>, vector<128x512xbf16>, vector<8x512xf32> -> vector<8x512xf32>
    %196 = arith.addf %192, %195 : vector<8x512xf32>
    %197 = vector.extract_strided_slice %196 {offsets = [0, 0], sizes = [8, 128], strides = [1, 1]} : vector<8x512xf32> to vector<8x128xf32>
    %198 = arith.negf %197 : vector<8x128xf32>
    %199 = math.exp %198 : vector<8x128xf32>
    %cst_69 = arith.constant 1.000000e+00 : f32
    %200 = vector.broadcast %cst_69 : f32 to vector<8x128xf32>
    %201 = arith.addf %200, %199 : vector<8x128xf32>
    %202 = arith.divf %200, %201 : vector<8x128xf32>
    %203 = vector.extract_strided_slice %196 {offsets = [0, 128], sizes = [8, 128], strides = [1, 1]} : vector<8x512xf32> to vector<8x128xf32>
    %204 = arith.negf %203 : vector<8x128xf32>
    %205 = math.exp %204 : vector<8x128xf32>
    %cst_70 = arith.constant 1.000000e+00 : f32
    %206 = vector.broadcast %cst_70 : f32 to vector<8x128xf32>
    %207 = arith.addf %206, %205 : vector<8x128xf32>
    %208 = arith.divf %206, %207 : vector<8x128xf32>
    %209 = vector.extract_strided_slice %196 {offsets = [0, 256], sizes = [8, 128], strides = [1, 1]} : vector<8x512xf32> to vector<8x128xf32>
    %210 = math.tanh %209 : vector<8x128xf32>
    %211 = vector.extract_strided_slice %196 {offsets = [0, 384], sizes = [8, 128], strides = [1, 1]} : vector<8x512xf32> to vector<8x128xf32>
    %212 = arith.negf %211 : vector<8x128xf32>
    %213 = math.exp %212 : vector<8x128xf32>
    %cst_71 = arith.constant 1.000000e+00 : f32
    %214 = vector.broadcast %cst_71 : f32 to vector<8x128xf32>
    %215 = arith.addf %214, %213 : vector<8x128xf32>
    %216 = arith.divf %214, %215 : vector<8x128xf32>
    %217 = arith.mulf %208, %184 : vector<8x128xf32>
    %218 = arith.mulf %202, %210 : vector<8x128xf32>
    %219 = arith.addf %217, %218 : vector<8x128xf32>
    %220 = math.tanh %219 : vector<8x128xf32>
    %221 = arith.mulf %216, %220 : vector<8x128xf32>
    %222 = arith.index_cast %190 : i32 to index
    %c0_72 = arith.constant 0 : index
    %223 = vector.load %arg18[%222, %c0_72] : memref<64x128xf32, #tpu.memory_space<vmem>>, vector<8x128xf32>
    tpu.vector_store %arg18[%222, %c0_72], %221 {strides = array<i32>} : memref<64x128xf32, #tpu.memory_space<vmem>>, vector<8x128xf32>,
    %c5_i32 = arith.constant 5 : i32
    %c8_i32_73 = arith.constant 8 : i32
    %224 = arith.muli %c5_i32, %c8_i32_73 : i32
    %225 = tpu.assume_multiple %224, 8 : i32
    %226 = arith.index_cast %225 : i32 to index
    %c0_74 = arith.constant 0 : index
    %227 = vector.load %arg17[%226, %c0_74] : memref<64x512xf32, #tpu.memory_space<vmem>>, vector<8x512xf32>
    %228 = arith.truncf %221 : vector<8x128xf32> to vector<8x128xbf16>
    %c0_75 = arith.constant 0 : index
    %c0_76 = arith.constant 0 : index
    %229 = vector.load %arg10[%c0_75, %c0_76] : memref<128x512xbf16, #tpu.memory_space<vmem>>, vector<128x512xbf16>
    %cst_77 = arith.constant dense<0.000000e+00> : vector<8x512xf32>
    %230 = tpu.matmul %228, %229, %cst_77 {dimension_numbers = #tpu.dot_dimension_numbers<[1], [0], [0], [1], [0, 0, 1, 1], [], []>} : vector<8x128xbf16>, vector<128x512xbf16>, vector<8x512xf32> -> vector<8x512xf32>
    %231 = arith.addf %227, %230 : vector<8x512xf32>
    %232 = vector.extract_strided_slice %231 {offsets = [0, 0], sizes = [8, 128], strides = [1, 1]} : vector<8x512xf32> to vector<8x128xf32>
    %233 = arith.negf %232 : vector<8x128xf32>
    %234 = math.exp %233 : vector<8x128xf32>
    %cst_78 = arith.constant 1.000000e+00 : f32
    %235 = vector.broadcast %cst_78 : f32 to vector<8x128xf32>
    %236 = arith.addf %235, %234 : vector<8x128xf32>
    %237 = arith.divf %235, %236 : vector<8x128xf32>
    %238 = vector.extract_strided_slice %231 {offsets = [0, 128], sizes = [8, 128], strides = [1, 1]} : vector<8x512xf32> to vector<8x128xf32>
    %239 = arith.negf %238 : vector<8x128xf32>
    %240 = math.exp %239 : vector<8x128xf32>
    %cst_79 = arith.constant 1.000000e+00 : f32
    %241 = vector.broadcast %cst_79 : f32 to vector<8x128xf32>
    %242 = arith.addf %241, %240 : vector<8x128xf32>
    %243 = arith.divf %241, %242 : vector<8x128xf32>
    %244 = vector.extract_strided_slice %231 {offsets = [0, 256], sizes = [8, 128], strides = [1, 1]} : vector<8x512xf32> to vector<8x128xf32>
    %245 = math.tanh %244 : vector<8x128xf32>
    %246 = vector.extract_strided_slice %231 {offsets = [0, 384], sizes = [8, 128], strides = [1, 1]} : vector<8x512xf32> to vector<8x128xf32>
    %247 = arith.negf %246 : vector<8x128xf32>
    %248 = math.exp %247 : vector<8x128xf32>
    %cst_80 = arith.constant 1.000000e+00 : f32
    %249 = vector.broadcast %cst_80 : f32 to vector<8x128xf32>
    %250 = arith.addf %249, %248 : vector<8x128xf32>
    %251 = arith.divf %249, %250 : vector<8x128xf32>
    %252 = arith.mulf %243, %219 : vector<8x128xf32>
    %253 = arith.mulf %237, %245 : vector<8x128xf32>
    %254 = arith.addf %252, %253 : vector<8x128xf32>
    %255 = math.tanh %254 : vector<8x128xf32>
    %256 = arith.mulf %251, %255 : vector<8x128xf32>
    %257 = arith.index_cast %225 : i32 to index
    %c0_81 = arith.constant 0 : index
    %258 = vector.load %arg18[%257, %c0_81] : memref<64x128xf32, #tpu.memory_space<vmem>>, vector<8x128xf32>
    tpu.vector_store %arg18[%257, %c0_81], %256 {strides = array<i32>} : memref<64x128xf32, #tpu.memory_space<vmem>>, vector<8x128xf32>,
    %c6_i32 = arith.constant 6 : i32
    %c8_i32_82 = arith.constant 8 : i32
    %259 = arith.muli %c6_i32, %c8_i32_82 : i32
    %260 = tpu.assume_multiple %259, 8 : i32
    %261 = arith.index_cast %260 : i32 to index
    %c0_83 = arith.constant 0 : index
    %262 = vector.load %arg17[%261, %c0_83] : memref<64x512xf32, #tpu.memory_space<vmem>>, vector<8x512xf32>
    %263 = arith.truncf %256 : vector<8x128xf32> to vector<8x128xbf16>
    %c0_84 = arith.constant 0 : index
    %c0_85 = arith.constant 0 : index
    %264 = vector.load %arg10[%c0_84, %c0_85] : memref<128x512xbf16, #tpu.memory_space<vmem>>, vector<128x512xbf16>
    %cst_86 = arith.constant dense<0.000000e+00> : vector<8x512xf32>
    %265 = tpu.matmul %263, %264, %cst_86 {dimension_numbers = #tpu.dot_dimension_numbers<[1], [0], [0], [1], [0, 0, 1, 1], [], []>} : vector<8x128xbf16>, vector<128x512xbf16>, vector<8x512xf32> -> vector<8x512xf32>
    %266 = arith.addf %262, %265 : vector<8x512xf32>
    %267 = vector.extract_strided_slice %266 {offsets = [0, 0], sizes = [8, 128], strides = [1, 1]} : vector<8x512xf32> to vector<8x128xf32>
    %268 = arith.negf %267 : vector<8x128xf32>
    %269 = math.exp %268 : vector<8x128xf32>
    %cst_87 = arith.constant 1.000000e+00 : f32
    %270 = vector.broadcast %cst_87 : f32 to vector<8x128xf32>
    %271 = arith.addf %270, %269 : vector<8x128xf32>
    %272 = arith.divf %270, %271 : vector<8x128xf32>
    %273 = vector.extract_strided_slice %266 {offsets = [0, 128], sizes = [8, 128], strides = [1, 1]} : vector<8x512xf32> to vector<8x128xf32>
    %274 = arith.negf %273 : vector<8x128xf32>
    %275 = math.exp %274 : vector<8x128xf32>
    %cst_88 = arith.constant 1.000000e+00 : f32
    %276 = vector.broadcast %cst_88 : f32 to vector<8x128xf32>
    %277 = arith.addf %276, %275 : vector<8x128xf32>
    %278 = arith.divf %276, %277 : vector<8x128xf32>
    %279 = vector.extract_strided_slice %266 {offsets = [0, 256], sizes = [8, 128], strides = [1, 1]} : vector<8x512xf32> to vector<8x128xf32>
    %280 = math.tanh %279 : vector<8x128xf32>
    %281 = vector.extract_strided_slice %266 {offsets = [0, 384], sizes = [8, 128], strides = [1, 1]} : vector<8x512xf32> to vector<8x128xf32>
    %282 = arith.negf %281 : vector<8x128xf32>
    %283 = math.exp %282 : vector<8x128xf32>
    %cst_89 = arith.constant 1.000000e+00 : f32
    %284 = vector.broadcast %cst_89 : f32 to vector<8x128xf32>
    %285 = arith.addf %284, %283 : vector<8x128xf32>
    %286 = arith.divf %284, %285 : vector<8x128xf32>
    %287 = arith.mulf %278, %254 : vector<8x128xf32>
    %288 = arith.mulf %272, %280 : vector<8x128xf32>
    %289 = arith.addf %287, %288 : vector<8x128xf32>
    %290 = math.tanh %289 : vector<8x128xf32>
    %291 = arith.mulf %286, %290 : vector<8x128xf32>
    %292 = arith.index_cast %260 : i32 to index
    %c0_90 = arith.constant 0 : index
    %293 = vector.load %arg18[%292, %c0_90] : memref<64x128xf32, #tpu.memory_space<vmem>>, vector<8x128xf32>
    tpu.vector_store %arg18[%292, %c0_90], %291 {strides = array<i32>} : memref<64x128xf32, #tpu.memory_space<vmem>>, vector<8x128xf32>,
    %c7_i32 = arith.constant 7 : i32
    %c8_i32_91 = arith.constant 8 : i32
    %294 = arith.muli %c7_i32, %c8_i32_91 : i32
    %295 = tpu.assume_multiple %294, 8 : i32
    %296 = arith.index_cast %295 : i32 to index
    %c0_92 = arith.constant 0 : index
    %297 = vector.load %arg17[%296, %c0_92] : memref<64x512xf32, #tpu.memory_space<vmem>>, vector<8x512xf32>
    %298 = arith.truncf %291 : vector<8x128xf32> to vector<8x128xbf16>
    %c0_93 = arith.constant 0 : index
    %c0_94 = arith.constant 0 : index
    %299 = vector.load %arg10[%c0_93, %c0_94] : memref<128x512xbf16, #tpu.memory_space<vmem>>, vector<128x512xbf16>
    %cst_95 = arith.constant dense<0.000000e+00> : vector<8x512xf32>
    %300 = tpu.matmul %298, %299, %cst_95 {dimension_numbers = #tpu.dot_dimension_numbers<[1], [0], [0], [1], [0, 0, 1, 1], [], []>} : vector<8x128xbf16>, vector<128x512xbf16>, vector<8x512xf32> -> vector<8x512xf32>
    %301 = arith.addf %297, %300 : vector<8x512xf32>
    %302 = vector.extract_strided_slice %301 {offsets = [0, 0], sizes = [8, 128], strides = [1, 1]} : vector<8x512xf32> to vector<8x128xf32>
    %303 = arith.negf %302 : vector<8x128xf32>
    %304 = math.exp %303 : vector<8x128xf32>
    %cst_96 = arith.constant 1.000000e+00 : f32
    %305 = vector.broadcast %cst_96 : f32 to vector<8x128xf32>
    %306 = arith.addf %305, %304 : vector<8x128xf32>
    %307 = arith.divf %305, %306 : vector<8x128xf32>
    %308 = vector.extract_strided_slice %301 {offsets = [0, 128], sizes = [8, 128], strides = [1, 1]} : vector<8x512xf32> to vector<8x128xf32>
    %309 = arith.negf %308 : vector<8x128xf32>
    %310 = math.exp %309 : vector<8x128xf32>
    %cst_97 = arith.constant 1.000000e+00 : f32
    %311 = vector.broadcast %cst_97 : f32 to vector<8x128xf32>
    %312 = arith.addf %311, %310 : vector<8x128xf32>
    %313 = arith.divf %311, %312 : vector<8x128xf32>
    %314 = vector.extract_strided_slice %301 {offsets = [0, 256], sizes = [8, 128], strides = [1, 1]} : vector<8x512xf32> to vector<8x128xf32>
    %315 = math.tanh %314 : vector<8x128xf32>
    %316 = vector.extract_strided_slice %301 {offsets = [0, 384], sizes = [8, 128], strides = [1, 1]} : vector<8x512xf32> to vector<8x128xf32>
    %317 = arith.negf %316 : vector<8x128xf32>
    %318 = math.exp %317 : vector<8x128xf32>
    %cst_98 = arith.constant 1.000000e+00 : f32
    %319 = vector.broadcast %cst_98 : f32 to vector<8x128xf32>
    %320 = arith.addf %319, %318 : vector<8x128xf32>
    %321 = arith.divf %319, %320 : vector<8x128xf32>
    %322 = arith.mulf %313, %289 : vector<8x128xf32>
    %323 = arith.mulf %307, %315 : vector<8x128xf32>
    %324 = arith.addf %322, %323 : vector<8x128xf32>
    %325 = math.tanh %324 : vector<8x128xf32>
    %326 = arith.mulf %321, %325 : vector<8x128xf32>
    %327 = arith.index_cast %295 : i32 to index
    %c0_99 = arith.constant 0 : index
    %328 = vector.load %arg18[%327, %c0_99] : memref<64x128xf32, #tpu.memory_space<vmem>>, vector<8x128xf32>
    tpu.vector_store %arg18[%327, %c0_99], %326 {strides = array<i32>} : memref<64x128xf32, #tpu.memory_space<vmem>>, vector<8x128xf32>,
    %c8_i32_100 = arith.constant 8 : i32
    %c0_101 = arith.constant 0 : index
    %c0_102 = arith.constant 0 : index
    %329 = vector.load %arg15[%c0_101, %c0_102] : memref<8x128xf32, #tpu.memory_space<vmem>>, vector<8x128xf32>
    tpu.vector_store %arg15[%c0_101, %c0_102], %326 {strides = array<i32>} : memref<8x128xf32, #tpu.memory_space<vmem>>, vector<8x128xf32>,
    %c0_103 = arith.constant 0 : index
    %c0_104 = arith.constant 0 : index
    %330 = vector.load %arg16[%c0_103, %c0_104] : memref<8x128xf32, #tpu.memory_space<vmem>>, vector<8x128xf32>
    tpu.vector_store %arg16[%c0_103, %c0_104], %324 {strides = array<i32>} : memref<8x128xf32, #tpu.memory_space<vmem>>, vector<8x128xf32>,
    %c0_105 = arith.constant 0 : index
    %c0_106 = arith.constant 0 : index
    %331 = vector.load %arg12[%c0_105, %c0_106] : memref<64x128xf32, #tpu.memory_space<vmem>>, vector<64x128xf32>
    %c0_107 = arith.constant 0 : index
    %c0_108 = arith.constant 0 : index
    %332 = vector.load %arg18[%c0_107, %c0_108] : memref<64x128xf32, #tpu.memory_space<vmem>>, vector<64x128xf32>
    %333 = arith.truncf %332 : vector<64x128xf32> to vector<64x128xbf16>
    %c0_109 = arith.constant 0 : index
    %c0_110 = arith.constant 0 : index
    %334 = vector.load %arg11[%c0_109, %c0_110] : memref<128x128xbf16, #tpu.memory_space<vmem>>, vector<128x128xbf16>
    %cst_111 = arith.constant dense<0.000000e+00> : vector<64x128xf32>
    %335 = tpu.matmul %333, %334, %cst_111 {dimension_numbers = #tpu.dot_dimension_numbers<[1], [0], [0], [1], [0, 0, 1, 1], [], []>} : vector<64x128xbf16>, vector<128x128xbf16>, vector<64x128xf32> -> vector<64x128xf32>
    %336 = arith.addf %331, %335 : vector<64x128xf32>
    %c0_112 = arith.constant 0 : index
    %c0_113 = arith.constant 0 : index
    %337 = vector.load %arg12[%c0_112, %c0_113] : memref<64x128xf32, #tpu.memory_space<vmem>>, vector<64x128xf32>
    tpu.vector_store %arg12[%c0_112, %c0_113], %336 {strides = array<i32>} : memref<64x128xf32, #tpu.memory_space<vmem>>, vector<64x128xf32>,
    %c0_i32_114 = arith.constant 0 : i32
    %338 = arith.cmpi eq, %arg0, %c0_i32_114 : i32
    %339 = arith.extui %338 : i1 to i32
    %c0_i32_115 = arith.constant 0 : i32
    %340 = arith.cmpi ne, %339, %c0_i32_115 : i32
    scf.if %340 {
      %c0_116 = arith.constant 0 : index
      %c0_117 = arith.constant 0 : index
      %341 = vector.load %arg13[%c0_116, %c0_117] : memref<8x128xf32, #tpu.memory_space<vmem>>, vector<8x128xf32>
      tpu.vector_store %arg13[%c0_116, %c0_117], %326 {strides = array<i32>} : memref<8x128xf32, #tpu.memory_space<vmem>>, vector<8x128xf32>,
      %c0_118 = arith.constant 0 : index
      %c0_119 = arith.constant 0 : index
      %342 = vector.load %arg14[%c0_118, %c0_119] : memref<8x128xf32, #tpu.memory_space<vmem>>, vector<8x128xf32>
      tpu.vector_store %arg14[%c0_118, %c0_119], %324 {strides = array<i32>} : memref<8x128xf32, #tpu.memory_space<vmem>>, vector<8x128xf32>,
    } else {
    }
    return
  }
  func.func @transform_0(%arg0: i32) -> (i32, i32) {
    %c0_i32 = arith.constant 0 : i32
    %c0_i32_0 = arith.constant 0 : i32
    return %arg0, %c0_i32 : i32, i32
  }
  func.func @transform_1(%arg0: i32) -> (i32, i32) {
    %c0_i32 = arith.constant 0 : i32
    %c0_i32_0 = arith.constant 0 : i32
    %c0_i32_1 = arith.constant 0 : i32
    return %c0_i32, %c0_i32_0 : i32, i32
  }
  func.func @transform_2(%arg0: i32) -> (i32, i32) {
    %c0_i32 = arith.constant 0 : i32
    %c0_i32_0 = arith.constant 0 : i32
    %c0_i32_1 = arith.constant 0 : i32
    return %c0_i32, %c0_i32_0 : i32, i32
  }
  func.func @transform_3(%arg0: i32) -> (i32, i32) {
    %c0_i32 = arith.constant 0 : i32
    %c0_i32_0 = arith.constant 0 : i32
    %c0_i32_1 = arith.constant 0 : i32
    return %c0_i32, %c0_i32_0 : i32, i32
  }
  func.func @transform_4(%arg0: i32) -> (i32, i32) {
    %c0_i32 = arith.constant 0 : i32
    %c0_i32_0 = arith.constant 0 : i32
    %c0_i32_1 = arith.constant 0 : i32
    return %c0_i32, %c0_i32_0 : i32, i32
  }
  func.func @transform_5(%arg0: i32) -> (i32, i32) {
    %c0_i32 = arith.constant 0 : i32
    %c0_i32_0 = arith.constant 0 : i32
    %c0_i32_1 = arith.constant 0 : i32
    return %c0_i32, %c0_i32_0 : i32, i32
  }
  func.func @transform_6(%arg0: i32) -> (i32, i32) {
    %c0_i32 = arith.constant 0 : i32
    %c0_i32_0 = arith.constant 0 : i32
    %c0_i32_1 = arith.constant 0 : i32
    return %c0_i32, %c0_i32_0 : i32, i32
  }
  func.func @transform_7(%arg0: i32) -> (i32, i32) {
    %c0_i32 = arith.constant 0 : i32
    %c0_i32_0 = arith.constant 0 : i32
    %c0_i32_1 = arith.constant 0 : i32
    return %c0_i32, %c0_i32_0 : i32, i32
  }
  func.func @transform_8(%arg0: i32) -> (i32, i32) {
    %c0_i32 = arith.constant 0 : i32
    %c0_i32_0 = arith.constant 0 : i32
    %c0_i32_1 = arith.constant 0 : i32
    return %c0_i32, %c0_i32_0 : i32, i32
  }
  func.func @transform_9(%arg0: i32) -> (i32, i32) {
    %c0_i32 = arith.constant 0 : i32
    %c0_i32_0 = arith.constant 0 : i32
    %c0_i32_1 = arith.constant 0 : i32
    return %c0_i32, %c0_i32_0 : i32, i32
  }
  func.func @transform_10(%arg0: i32) -> (i32, i32) {
    %c0_i32 = arith.constant 0 : i32
    %c0_i32_0 = arith.constant 0 : i32
    %c0_i32_1 = arith.constant 0 : i32
    return %c0_i32, %c0_i32_0 : i32, i32
  }
  func.func @transform_11(%arg0: i32) -> (i32, i32) {
    %c0_i32 = arith.constant 0 : i32
    %c0_i32_0 = arith.constant 0 : i32
    return %arg0, %c0_i32 : i32, i32
  }
  func.func @transform_12(%arg0: i32) -> (i32, i32) {
    %c0_i32 = arith.constant 0 : i32
    %c0_i32_0 = arith.constant 0 : i32
    %c0_i32_1 = arith.constant 0 : i32
    return %c0_i32, %c0_i32_0 : i32, i32
  }
  func.func @transform_13(%arg0: i32) -> (i32, i32) {
    %c0_i32 = arith.constant 0 : i32
    %c0_i32_0 = arith.constant 0 : i32
    %c0_i32_1 = arith.constant 0 : i32
    return %c0_i32, %c0_i32_0 : i32, i32
  }
}

</mosaic_0001>

<bundles_post_ra>
// kernel: agent_forward.1
= control target key start
LH: loop header
LB: loop body
LE: loop exit
PB: predicated region body
PF: predicated region fallthrough
CT: control target
= control target key end

     0   :  { %s5570_s3 = inlined_call_operand.vmem [shape: bf16[128,128], index: 3, kind: input, shape index: {}]   ;;  %s5571_s0 = inlined_call_operand.vmem [shape: f32[64,128], index: 0, kind: input, shape index: {}]   ;;  %s5572_s4 = inlined_call_operand.vmem [shape: f32[1,128], index: 4, kind: input, shape index: {}]   ;;  %s5573_s7 = inlined_call_operand.vmem [shape: bf16[128,640], index: 7, kind: input, shape index: {}]   ;;  %s5574_s9 = inlined_call_operand.vmem [shape: bf16[128,512], index: 9, kind: input, shape index: {}]   ;;  %s5575_s5 = inlined_call_operand.vmem [shape: f32[1,128], index: 5, kind: input, shape index: {}]   ;;  %s5576_s6 = inlined_call_operand.vmem [shape: f32[1,128], index: 6, kind: input, shape index: {}]   ;;  %s5577_s1 = inlined_call_operand.vmem [shape: f32[8,128], index: 1, kind: input, shape index: {}]   ;;  %s5578_s8 = inlined_call_operand.vmem [shape: f32[1,640], index: 8, kind: input, shape index: {}]   ;;  %s5579_s2 = inlined_call_operand.vmem [shape: f32[8,128], index: 2, kind: input, shape index: {}]   ;;  %s5580_s10 = inlined_call_operand.vmem [shape: bf16[128,128], index: 10, kind: input, shape index: {}]   ;;  %s5581_s13 = inlined_call_operand.vmem [shape: f32[8,128], index: 13, kind: output, shape index: {2}]   ;;  %s5582_s11 = inlined_call_operand.vmem [shape: f32[64,128], index: 11, kind: output, shape index: {0}]   ;;  %s5583_s12 = inlined_call_operand.vmem [shape: f32[8,128], index: 12, kind: output, shape index: {1}]  }
   0x1   :  { %v4031_v0 = vld [vmem:[%s5570_s3] sm:$0xff]   ;;  %v4032_v1 = vld [vmem:[%s5570_s3 + $0x8] sm:$0xff]   ;;  %v4033_v2 = vld [vmem:[%s5570_s3 + $0x10] sm:$0xff]  }
   0x2   :  { %3926 = vmatprep.subr.bf16.mxu0 %v4031_v0  ;;  %v4034_v3 = vld [vmem:[%s5570_s3 + $0x18] sm:$0xff]   ;;  %v50_v4 = vld [vmem:[%s5571_s0] sm:$0xff]  ;;  %v51_v5 = vld [vmem:[%s5571_s0 + $0x8] sm:$0xff] }
   0x3   :  { %3927 = vmatpush3.bf16.msra.mxu0 %v4031_v0  ;;  %v58_v6 = vpack.c.bf16 %v51_v5, %v50_v4  ;;  %v4035_v7 = vld [vmem:[%s5570_s3 + $0x20] sm:$0xff]   ;;  %v4036_v8 = vld [vmem:[%s5570_s3 + $0x28] sm:$0xff]   ;;  %v4037_v9 = vld [vmem:[%s5570_s3 + $0x30] sm:$0xff]  }
   0x4   :  { %3928 = vmatprep.subr.bf16.mxu0 %v4032_v1  ;;  %v4038_v10 = vld [vmem:[%s5570_s3 + $0x38] sm:$0xff]   ;;  %v52_v11 = vld [vmem:[%s5571_s0 + $0x10] sm:$0xff]  ;;  %v54_v13 = vld [vmem:[%s5571_s0 + $0x20] sm:$0xff] }
   0x5   :  { %3942 = vmatprep.mubr.bf16.mxu0 %v58_v6  ;;  %v53_v12 = vld [vmem:[%s5571_s0 + $0x18] sm:$0xff]  ;;  %v55_v14 = vld [vmem:[%s5571_s0 + $0x28] sm:$0xff]  ;;  %v56_v17 = vld [vmem:[%s5571_s0 + $0x30] sm:$0xff] }
   0x6   :  { %v59_v15 = vpack.c.bf16 %v53_v12, %v52_v11  ;;  %v60_v16 = vpack.c.bf16 %v55_v14, %v54_v13  ;;  %v57_v18 = vld [vmem:[%s5571_s0 + $0x38] sm:$0xff]  ;;  %v3551_v20 = vld [vmem:[%s5572_s4] ss:$0 sm:$0xff]  ;;  %v4045_v49 = vld [vmem:[%s5573_s7 + $0x10] ss:$20 sps:$4 sm:$0xff]  }
   0x7   :  { %3929 = vmatpush3.bf16.msra.mxu0 %v4032_v1  ;;  %v61_v19 = vpack.c.bf16 %v57_v18, %v56_v17  ;;  %v4039_v45 = vld [vmem:[%s5573_s7] ss:$20 sps:$4 sm:$0xff]   ;;  %v4041_v46 = vld [vmem:[%s5573_s7 + $0x4] ss:$20 sps:$4 sm:$0xff]   ;;  %v4042_v48 = vld [vmem:[%s5573_s7 + $0x28] ss:$20 sps:$4 sm:$0xff]   ;;  %3950 = vmatprep.subr.bf16.mxu1 %v4045_v49 }
   0x8   :  { %3930 = vmatprep.subr.bf16.mxu0 %v4033_v2  ;;  %v4044_v47 = vld [vmem:[%s5573_s7 + $0x2c] ss:$20 sps:$4 sm:$0xff]   ;;  %3951 = vmatpush3.bf16.msra.mxu1 %v4045_v49 }
   0x9   :  { %v4049_v18 = vld [vmem:[%s5573_s7 + $0x38] ss:$20 sps:$4 sm:$0xff]  }
   0xa   :  { %3952 = vmatprep.subr.bf16.mxu1 %v4049_v18 }
   0xb   :  { %3931 = vmatpush3.bf16.msra.mxu0 %v4033_v2 }
   0xc   :  { %3932 = vmatprep.subr.bf16.mxu0 %v4034_v3  ;;  %3953 = vmatpush3.bf16.msra.mxu1 %v4049_v18 }
   0xf   :  { %3933 = vmatpush3.bf16.msra.mxu0 %v4034_v3 }
  0x10   :  { %3934 = vmatprep.subr.bf16.mxu0 %v4035_v7 }
  0x13   :  { %3935 = vmatpush3.bf16.msra.mxu0 %v4035_v7 }
  0x14   :  { %3936 = vmatprep.subr.bf16.mxu0 %v4036_v8 }
  0x17   :  { %3937 = vmatpush3.bf16.msra.mxu0 %v4036_v8 }
  0x18   :  { %3938 = vmatprep.subr.bf16.mxu0 %v4037_v9 }
  0x1b   :  { %3939 = vmatpush3.bf16.msra.mxu0 %v4037_v9 }
  0x1c   :  { %3940 = vmatprep.subr.bf16.mxu0 %v4038_v10 }
  0x1f   :  { %3941 = vmatpush3.bf16.msra.mxu0 %v4038_v10 }
  0x20   :  { %612 = vmatprep.subr.bf16.mxu0 %v4041_v46 }
  0x22   :  { %3943 = vmatmul.mubr.bf16.vlgmr.msra.gmra.mrb[0].mxu0 %v59_v15 }
  0x23   :  { %3946 = vmatprep.mubr.bf16.mxu0 %v60_v16  ;;  %613 = vmatpush1.bf16.msra.mxu0 %v4039_v45 }
  0x24   :  { %614 = vmatprep.subr.bf16.mxu0 %v4044_v47 }
  0x27   :  { %615 = vmatpush1.bf16.msra.mxu0 %v4042_v48 }
  0x2a   :  { %3947 = vmatmul.mubr.bf16.gmra.mrb[4].mxu0 %v61_v19  ;;  %v4048_v19 = vld [vmem:[%s5573_s7 + $0x54] ss:$20 sps:$4 sm:$0xff]  }
  0x2b   :  { %616 = vmatprep.subr.bf16.mxu0 %v4048_v19 }
  0xf5   :  { %v3944_v21 = vpop.f32.mrb[0].mxu0 }
  0xf6   :  { %v176_v22 = vadd.f32 %v3944_v21, %v3551_v20  ;;  %v167_v23 = vpop.f32.mrb[1].mxu0  ;;  %v4053_v21 = vld [vmem:[%s5573_s7 + $0x60] ss:$20 sps:$4 sm:$0xff]  }
  0xf7   :  { %v168_v24 = vadd.f32 %v3551_v20, %v167_v23  ;;  %v3945_v25 = vpop.f32.mrb[2].mxu0  ;;  %v4050_v23 = vld [vmem:[%s5573_s7 + $0x78] ss:$20 sps:$4 sm:$0xff]   ;;  %3954 = vmatprep.subr.bf16.mxu1 %v4053_v21 }
  0xf8   :  { %4223 = vtanh.f32 %v176_v22  ;;  %v179_v26 = vadd.f32 %v3945_v25, %v3551_v20  ;;  %v170_v27 = vpop.f32.mrb[3].mxu0  ;;  %v4052_v22 = vld [vmem:[%s5573_s7 + $0x7c] ss:$20 sps:$4 sm:$0xff]   ;;  %3955 = vmatpush3.bf16.msra.mxu1 %v4053_v21  ;;  %v4056_v25 = vld [vmem:[%s5573_s7 + $0xa4] ss:$20 sps:$4 sm:$0xff]  }
  0xf9   :  { %4225 = vtanh.f32 %v168_v24  ;;  %v171_v28 = vadd.f32 %v3551_v20, %v170_v27  ;;  %v4057_v24 = vld [vmem:[%s5573_s7 + $0x88] ss:$20 sps:$4 sm:$0xff]   ;;  %v4061_v27 = vld [vmem:[%s5573_s7 + $0xb0] ss:$20 sps:$4 sm:$0xff]  }
  0xfa   :  { %4227 = vtanh.f32 %v179_v26  ;;  %v4054_v26 = vld [vmem:[%s5573_s7 + $0xa0] ss:$20 sps:$4 sm:$0xff]   ;;  %3956 = vmatprep.subr.bf16.mxu1 %v4057_v24 }
  0xfb   :  { %4229 = vtanh.f32 %v171_v28  ;;  %v4060_v28 = vld [vmem:[%s5573_s7 + $0xcc] ss:$20 sps:$4 sm:$0xff]  }
  0xfc   :  { %3957 = vmatpush3.bf16.msra.mxu1 %v4057_v24 }
  0xfd   :  { %v3948_v29 = vpop.f32.mrb[4].mxu0  ;;  %3958 = vmatprep.subr.bf16.mxu1 %v4061_v27 }
  0xfe   :  { %v192_v30 = vadd.f32 %v3948_v29, %v3551_v20  ;;  %v183_v31 = vpop.f32.mrb[5].mxu0  ;;  %v4058_v29 = vld [vmem:[%s5573_s7 + $0xc8] ss:$20 sps:$4 sm:$0xff]  }
  0xff   :  { %v184_v32 = vadd.f32 %v3551_v20, %v183_v31  ;;  %v3949_v33 = vpop.f32.mrb[6].mxu0  ;;  %v4064_v31 = vld [vmem:[%s5573_s7 + $0xf4] ss:$20 sps:$4 sm:$0xff]  }
 0x100   :  { %v186_v34 = vpop.f32.mrb[7].mxu0  ;;  %v195_v35 = vadd.f32 %v3949_v33, %v3551_v20  ;;  %3959 = vmatpush3.bf16.msra.mxu1 %v4061_v27  ;;  %v4066_v33 = vld [vmem:[%s5573_s7 + $0x118] ss:$20 sps:$4 sm:$0xff]  }
 0x101   :  { %4231 = vtanh.f32 %v184_v32  ;;  %v187_v36 = vadd.f32 %v3551_v20, %v186_v34  ;;  %v4046_v20 = vld [vmem:[%s5573_s7 + $0x50] ss:$20 sps:$4 sm:$0xff]  }
 0x102   :  { %v4224_v37 = vpop.eup %4223  ;;  %4233 = vtanh.f32 %v192_v30  ;;  %617 = vmatpush1.bf16.msra.mxu0 %v4046_v20  ;;  %v4065_v30 = vld [vmem:[%s5573_s7 + $0xd8] ss:$20 sps:$4 sm:$0xff]   ;;  %v4062_v32 = vld [vmem:[%s5573_s7 + $0xf0] ss:$20 sps:$4 sm:$0xff]  }
 0x103   :  { %v4226_v38 = vpop.eup %4225  ;;  %4235 = vtanh.f32 %v187_v36  ;;  %210 = vadd.xlane.f32.xlu1 %v4224_v37  ;;  %618 = vmatprep.subr.bf16.mxu0 %v4052_v22  ;;  %v4068_v34 = vld [vmem:[%s5573_s7 + $0x11c] ss:$20 sps:$4 sm:$0xff]   ;;  %v4072_v36 = vld [vmem:[%s5573_s7 + $0xc] ss:$20 sps:$4 sm:$0xff]  }
 0x104   :  { %206 = vadd.xlane.f32.xlu0 %v4226_v38  ;;  %4237 = vtanh.f32 %v195_v35  ;;  %v4228_v39 = vpop.eup %4227  ;;  %3960 = vmatprep.subr.bf16.mxu1 %v4065_v30  ;;  %v4069_v35 = vld [vmem:[%s5573_s7 + $0x100] ss:$20 sps:$4 sm:$0xff]  }
 0x105   :  { %v4230_v40 = vpop.eup %4229  ;;  %3961 = vmatpush3.bf16.msra.mxu1 %v4065_v30 }
 0x106   :  { %619 = vmatpush1.bf16.msra.mxu0 %v4050_v23  ;;  %3962 = vmatprep.subr.bf16.mxu1 %v4069_v35  ;;  %v4070_v23 = vld [vmem:[%s5573_s7 + $0x8] ss:$20 sps:$4 sm:$0xff]  }
 0x107   :  { %212 = vadd.xlane.f32.xlu1 %v4228_v39  ;;  %620 = vmatprep.subr.bf16.mxu0 %v4056_v25 }
 0x108   :  { %208 = vadd.xlane.f32.xlu0 %v4230_v40 }
 0x109   :  { %3963 = vmatpush3.bf16.msra.mxu1 %v4069_v35 }
 0x10a   :  { %621 = vmatpush1.bf16.msra.mxu0 %v4054_v26 }
 0x10b   :  { %v4232_v41 = vpop.eup %4231  ;;  %622 = vmatprep.subr.bf16.mxu0 %v4060_v28 }
 0x10c   :  { %v4234_v42 = vpop.eup %4233  ;;  %214 = vadd.xlane.f32.xlu0 %v4232_v41 }
 0x10d   :  { %v4236_v43 = vpop.eup %4235 }
 0x10e   :  { %216 = vadd.xlane.f32.xlu1 %v4236_v43  ;;  %v4238_v44 = vpop.eup %4237  ;;  %623 = vmatpush1.bf16.msra.mxu0 %v4058_v29 }
 0x10f   :  { %624 = vmatprep.subr.bf16.mxu0 %v4064_v31  ;;  %v4648_v31 = vld [vmem:[%s5574_s9 + $0x8] ss:$16 sps:$4 sm:$0xff]  }
 0x110   :  { %218 = vadd.xlane.f32.xlu0 %v4234_v42 }
 0x112   :  { %220 = vadd.xlane.f32.xlu1 %v4238_v44  ;;  %625 = vmatpush1.bf16.msra.mxu0 %v4062_v32 }
 0x113   :  { %626 = vmatprep.subr.bf16.mxu0 %v4068_v34  ;;  %v4660_v34 = vld [vmem:[%s5574_s9 + $0x2c] ss:$16 sps:$4 sm:$0xff]  }
 0x116   :  { %627 = vmatpush1.bf16.msra.mxu0 %v4066_v33 }
 0x117   :  { %685 = vmatprep.subr.bf16.mxu0 %v4072_v36 }
 0x190   :  { %v211_v50 = vpop.xlane.xlu1 %210 }
 0x191   :  { %v207_v51 = vpop.xlane.xlu0 %206  ;;  %v225_v52 = vmul.f32 0.0078125, %v211_v50 }
 0x192   :  { %v223_v53 = vmul.f32 0.0078125, %v207_v51 }
 0x193   :  { %v4523_v57 = vsub.f32 %v4224_v37, %v225_v52  ;;  %v4073_v37 = vld [vmem:[%s5573_s7 + $0x128] ss:$20 sps:$4 sm:$0xff]  }
 0x194   :  { %v4521_v54 = vsub.f32 %v4226_v38, %v223_v53  ;;  %v213_v55 = vpop.xlane.xlu1 %212  ;;  %v5584_v38 = vmov 0   ;;  %3964 = vmatprep.subr.bf16.mxu1 %v4073_v37 }
 0x195   :  { %v209_v56 = vpop.xlane.xlu0 %208  ;;  %v226_v58 = vmul.f32 0.0078125, %v213_v55  ;;  %v241_v1 = vmul.f32 %v4523_v57, %v4523_v57  ;;  %644 = vmatprep.mubr.bf16.mxu0 %v5584_v38  ;;  %3965 = vmatpush3.bf16.msra.mxu1 %v4073_v37 }
 0x196   :  { %v224_v59 = vmul.f32 0.0078125, %v209_v56  ;;  %v239_v60 = vmul.f32 %v4521_v54, %v4521_v54 }
 0x197   :  { %v4529_v63 = vsub.f32 %v4228_v39, %v226_v58  ;;  %v4617_v39 = vld [vmem:[%s5574_s9 + $0xc] ss:$16 sps:$4 sm:$0xff]  }
 0x198   :  { %v4527_v61 = vsub.f32 %v4230_v40, %v224_v59  ;;  %247 = vadd.xlane.f32.xlu0 %v239_v60  ;;  %1106 = vmatprep.subr.bf16.mxu1 %v4617_v39 }
 0x199   :  { %v215_v62 = vpop.xlane.xlu0 %214  ;;  %v242_v9 = vmul.f32 %v4529_v63, %v4529_v63 }
 0x19a   :  { %v227_v0 = vmul.f32 0.0078125, %v215_v62  ;;  %v240_v2 = vmul.f32 %v4527_v61, %v4527_v61 }
 0x19b   :  { %v217_v3 = vpop.xlane.xlu1 %216 }
 0x19c   :  { %v4535_v4 = vsub.f32 %v4232_v41, %v227_v0  ;;  %v228_v5 = vmul.f32 0.0078125, %v217_v3  ;;  %251 = vadd.xlane.f32.xlu0 %v241_v1  ;;  %249 = vadd.xlane.f32.xlu1 %v240_v2 }
 0x19d   :  { %v219_v6 = vpop.xlane.xlu0 %218 }
 0x19e   :  { %v4537_v7 = vsub.f32 %v4236_v43, %v228_v5  ;;  %v229_v8 = vmul.f32 0.0078125, %v219_v6  ;;  %v243_v10 = vmul.f32 %v4535_v4, %v4535_v4  ;;  %v3560_v5 = vld [vmem:[%s5575_s5] ss:$0 sm:$0xff] }
 0x19f   :  { %v221_v11 = vpop.xlane.xlu1 %220 }
 0x1a0   :  { %v4543_v12 = vsub.f32 %v4234_v42, %v229_v8  ;;  %v230_v13 = vmul.f32 0.0078125, %v221_v11  ;;  %253 = vadd.xlane.f32.xlu1 %v242_v9  ;;  %255 = vadd.xlane.f32.xlu0 %v243_v10  ;;  %v244_v15 = vmul.f32 %v4537_v7, %v4537_v7 }
 0x1a2   :  { %v4545_v14 = vsub.f32 %v4238_v44, %v230_v13  ;;  %v245_v16 = vmul.f32 %v4543_v12, %v4543_v12 }
 0x1a4   :  { %257 = vadd.xlane.f32.xlu1 %v244_v15  ;;  %259 = vadd.xlane.f32.xlu0 %v245_v16  ;;  %v246_v17 = vmul.f32 %v4545_v14, %v4545_v14  ;;  %v3561_v15 = vld [vmem:[%s5576_s6] ss:$0 sm:$0xff] }
 0x1a8   :  { %261 = vadd.xlane.f32.xlu1 %v246_v17 }
 0x225   :  { %v248_v40 = vpop.xlane.xlu0 %247 }
 0x226   :  { %v263_v41 = vmul.f32 0.0078125, %v248_v40 }
 0x228   :  { %v271_v42 = vadd.f32 1e-05, %v263_v41 }
 0x229   :  { %v250_v43 = vpop.xlane.xlu1 %249  ;;  %v252_v44 = vpop.xlane.xlu0 %251 }
 0x22a   :  { %4239 = vrsqrt.f32 %v271_v42  ;;  %v264_v45 = vmul.f32 0.0078125, %v250_v43  ;;  %v265_v46 = vmul.f32 0.0078125, %v252_v44  ;;  %v4080_v42 = vld [vmem:[%s5573_s7 + $0x58] ss:$20 sps:$4 sm:$0xff]  }
 0x22b   :  { %v4671_v43 = vld [vmem:[%s5574_s9 + $0x28] ss:$16 sps:$4 sm:$0xff]  }
 0x22c   :  { %v272_v47 = vadd.f32 1e-05, %v264_v45  ;;  %v273_v48 = vadd.f32 1e-05, %v265_v46  ;;  %v4682_v45 = vld [vmem:[%s5574_s9 + $0x4c] ss:$16 sps:$4 sm:$0xff]  }
 0x22d   :  { %v254_v49 = vpop.xlane.xlu1 %253  ;;  %v256_v50 = vpop.xlane.xlu0 %255 }
 0x22e   :  { %4241 = vrsqrt.f32 %v272_v47  ;;  %v266_v51 = vmul.f32 0.0078125, %v254_v49  ;;  %v267_v52 = vmul.f32 0.0078125, %v256_v50  ;;  %v4086_v49 = vld [vmem:[%s5573_s7 + $0x80] ss:$20 sps:$4 sm:$0xff]   ;;  %v4693_v50 = vld [vmem:[%s5574_s9 + $0x48] ss:$16 sps:$4 sm:$0xff]  }
 0x22f   :  { %4243 = vrsqrt.f32 %v273_v48 }
 0x230   :  { %v274_v53 = vadd.f32 1e-05, %v266_v51  ;;  %v275_v55 = vadd.f32 1e-05, %v267_v52  ;;  %v4094_v52 = vld [vmem:[%s5573_s7 + $0xac] ss:$20 sps:$4 sm:$0xff]  }
 0x231   :  { %v258_v56 = vpop.xlane.xlu1 %257  ;;  %v260_v58 = vpop.xlane.xlu0 %259 }
 0x232   :  { %4245 = vrsqrt.f32 %v274_v53  ;;  %v268_v59 = vmul.f32 0.0078125, %v258_v56  ;;  %v269_v60 = vmul.f32 0.0078125, %v260_v58  ;;  %v4704_v53 = vld [vmem:[%s5574_s9 + $0x6c] ss:$16 sps:$4 sm:$0xff]   ;;  %v4715_v56 = vld [vmem:[%s5574_s9 + $0x68] ss:$16 sps:$4 sm:$0xff]  }
 0x233   :  { %4247 = vrsqrt.f32 %v275_v55  ;;  %v4092_v55 = vld [vmem:[%s5573_s7 + $0xa8] ss:$20 sps:$4 sm:$0xff]  }
 0x234   :  { %v4240_v62 = vpop.eup %4239  ;;  %v276_v0 = vadd.f32 1e-05, %v268_v59  ;;  %v277_v1 = vadd.f32 1e-05, %v269_v60  ;;  %v4100_v58 = vld [vmem:[%s5573_s7 + $0xd4] ss:$20 sps:$4 sm:$0xff]  }
 0x235   :  { %v287_v2 = vmul.f32 %v4240_v62, %v4521_v54  ;;  %v262_v3 = vpop.xlane.xlu1 %261  ;;  %v4724_v59 = vld [vmem:[%s5574_s9 + $0x8c] ss:$16 sps:$4 sm:$0xff]   ;;  %v4098_v60 = vld [vmem:[%s5573_s7 + $0xd0] ss:$20 sps:$4 sm:$0xff]   ;;  %v4735_v62 = vld [vmem:[%s5574_s9 + $0x88] ss:$16 sps:$4 sm:$0xff]  }
 0x236   :  { %4249 = vrsqrt.f32 %v276_v0  ;;  %v270_v6 = vmul.f32 0.0078125, %v262_v3  ;;  %v4106_v0 = vld [vmem:[%s5573_s7 + $0xfc] ss:$20 sps:$4 sm:$0xff]   ;;  %v4754_v3 = vld [vmem:[%s5574_s9 + $0xa8] ss:$16 sps:$4 sm:$0xff]  }
 0x237   :  { %4251 = vrsqrt.f32 %v277_v1  ;;  %v302_v11 = vmul.f32 %v3560_v5, %v287_v2  ;;  %v4744_v1 = vld [vmem:[%s5574_s9 + $0xac] ss:$16 sps:$4 sm:$0xff]  }
 0x238   :  { %v4242_v8 = vpop.eup %4241  ;;  %v278_v9 = vadd.f32 1e-05, %v270_v6  ;;  %v4104_v2 = vld [vmem:[%s5573_s7 + $0xf8] ss:$20 sps:$4 sm:$0xff]  }
 0x239   :  { %v4244_v10 = vpop.eup %4243  ;;  %v288_v13 = vmul.f32 %v4242_v8, %v4527_v61  ;;  %v317_v20 = vadd.f32 %v3561_v15, %v302_v11  ;;  %v4763_v6 = vld [vmem:[%s5574_s9 + $0xcc] ss:$16 sps:$4 sm:$0xff]   ;;  %v4110_v8 = vld [vmem:[%s5573_s7 + $0x120] ss:$20 sps:$4 sm:$0xff]  }
 0x23a   :  { %4253 = vrsqrt.f32 %v278_v9  ;;  %v289_v54 = vmul.f32 %v4244_v10, %v4523_v57  ;;  %v4076_v57 = vld [vmem:[%s5573_s7 + $0x34] ss:$20 sps:$4 sm:$0xff]   ;;  %v4784_v11 = vld [vmem:[%s5574_s9 + $0xec] ss:$16 sps:$4 sm:$0xff]  }
 0x23b   :  { %v303_v16 = vmul.f32 %v3560_v5, %v288_v13  ;;  %v4773_v9 = vld [vmem:[%s5574_s9 + $0xc8] ss:$16 sps:$4 sm:$0xff]   ;;  %v4779_v10 = vld [vmem:[%s5574_s9 + $0x4] ss:$16 sps:$4 sm:$0xff]   ;;  %v4791_v13 = vld [vmem:[%s5574_s9] ss:$16 sps:$4 sm:$0xff]  }
 0x23c   :  { %v4246_v17 = vpop.eup %4245  ;;  %v304_v18 = vmul.f32 %v3560_v5, %v289_v54  ;;  %v46_v54 = vld [vmem:[%s5577_s1] sm:$0xff] }
 0x23d   :  { %v4248_v19 = vpop.eup %4247  ;;  %v318_v21 = vadd.f32 %v3561_v15, %v303_v16  ;;  %v290_v22 = vmul.f32 %v4246_v17, %v4529_v63  ;;  %v4806_v16 = vld [vmem:[%s5574_s9 + $0x24] ss:$16 sps:$4 sm:$0xff]   ;;  %v872_v17 = vpack.c.bf16 %v46_v54, %v46_v54 }
 0x23e   :  { %v291_v61 = vmul.f32 %v4248_v19, %v4535_v4  ;;  %v319_v27 = vadd.f32 %v3561_v15, %v304_v18  ;;  %v4074_v4 = vld [vmem:[%s5573_s7 + $0x30] ss:$20 sps:$4 sm:$0xff]  }
 0x23f   :  { %v4634_v24 = vpack.c.bf16 %v318_v21, %v317_v20  ;;  %v305_v25 = vmul.f32 %v3560_v5, %v290_v22  ;;  %v4814_v18 = vld [vmem:[%s5574_s9 + $0x20] ss:$16 sps:$4 sm:$0xff]   ;;  %v4821_v19 = vld [vmem:[%s5574_s9 + $0x44] ss:$16 sps:$4 sm:$0xff]  }
 0x240   :  { %v4250_v26 = vpop.eup %4249  ;;  %v306_v30 = vmul.f32 %v3560_v5, %v291_v61  ;;  %v4828_v20 = vld [vmem:[%s5574_s9 + $0x40] ss:$16 sps:$4 sm:$0xff]   ;;  %v4835_v21 = vld [vmem:[%s5574_s9 + $0x64] ss:$16 sps:$4 sm:$0xff]  }
 0x241   :  { %v4252_v28 = vpop.eup %4251  ;;  %645 = vmatmul.mubr.bf16.vlgmr.msra.gmra.mrb[8].mxu0 %v4634_v24  ;;  %3966 = vmatprep.mubr.bf16.mxu1 %v4634_v24  ;;  %v320_v63 = vadd.f32 %v3561_v15, %v305_v25  ;;  %v292_v29 = vmul.f32 %v4250_v26, %v4537_v7  ;;  %v4082_v7 = vld [vmem:[%s5573_s7 + $0x5c] ss:$20 sps:$4 sm:$0xff]   ;;  %v4881_v25 = vld [vmem:[%s5574_s9 + $0xc4] ss:$16 sps:$4 sm:$0xff]  }
 0x242   :  { %686 = vmatpush1.bf16.msra.mxu0 %v4070_v23  ;;  %654 = vmatprep.mubr.bf16.mxu0 %v5584_v38  ;;  %v293_v32 = vmul.f32 %v4252_v28, %v4543_v12  ;;  %v321_v37 = vadd.f32 %v3561_v15, %v306_v30  ;;  %v4844_v22 = vld [vmem:[%s5574_s9 + $0x60] ss:$16 sps:$4 sm:$0xff]   ;;  %v4851_v23 = vld [vmem:[%s5574_s9 + $0x84] ss:$16 sps:$4 sm:$0xff]  }
 0x243   :  { %687 = vmatprep.subr.bf16.mxu0 %v4076_v57  ;;  %v4652_v33 = vpack.c.bf16 %v320_v63, %v319_v27  ;;  %v307_v35 = vmul.f32 %v3560_v5, %v292_v29  ;;  %v4859_v61 = vld [vmem:[%s5574_s9 + $0x80] ss:$16 sps:$4 sm:$0xff]   ;;  %v4895_v27 = vld [vmem:[%s5574_s9 + $0xe4] ss:$16 sps:$4 sm:$0xff]  }
 0x244   :  { %v4254_v36 = vpop.eup %4253  ;;  %v308_v41 = vmul.f32 %v3560_v5, %v293_v32  ;;  %v4874_v57 = vld [vmem:[%s5574_s9 + $0xa0] ss:$16 sps:$4 sm:$0xff]  }
 0x245   :  { %3967 = vmatmul.mubr.bf16.vlgmr.msra.gmra.mrb[0].mxu1 %v4652_v33  ;;  %v322_v40 = vadd.f32 %v3561_v15, %v307_v35  ;;  %v294_v12 = vmul.f32 %v4254_v36, %v4545_v14  ;;  %v4088_v14 = vld [vmem:[%s5573_s7 + $0x84] ss:$20 sps:$4 sm:$0xff]   ;;  %v4889_v26 = vld [vmem:[%s5574_s9 + $0xc0] ss:$16 sps:$4 sm:$0xff]  }
 0x246   :  { %688 = vmatpush1.bf16.msra.mxu0 %v4074_v4  ;;  %1107 = vmatpush1.bf16.msra.mxu1 %v4648_v31  ;;  %v323_v47 = vadd.f32 %v3561_v15, %v308_v41  ;;  %v4904_v28 = vld [vmem:[%s5574_s9 + $0xe0] ss:$16 sps:$4 sm:$0xff]  }
 0x247   :  { %689 = vmatprep.subr.bf16.mxu0 %v4082_v7  ;;  %1108 = vmatprep.subr.bf16.mxu1 %v4660_v34  ;;  %v4674_v44 = vpack.c.bf16 %v322_v40, %v321_v37  ;;  %v309_v46 = vmul.f32 %v3560_v5, %v294_v12  ;;  %v4112_v5 = vld [vmem:[%s5573_s7 + $0x124] ss:$20 sps:$4 sm:$0xff]  }
 0x248   :  { %v377_v30 = vld [vmem:[%s5578_s8] sm:$0x1f] }
 0x249   :  { %655 = vmatmul.mubr.bf16.gmra.mrb[12].mxu0 %v4652_v33  ;;  %3970 = vmatprep.mubr.bf16.mxu1 %v4674_v44  ;;  %v324_v48 = vadd.f32 %v3561_v15, %v309_v46  ;;  %v4796_v15 = vld [vmem:[%s5574_s9 + $0xe8] ss:$16 sps:$4 sm:$0xff]  }
 0x24a   :  { %690 = vmatpush1.bf16.msra.mxu0 %v4080_v42  ;;  %1109 = vmatpush1.bf16.msra.mxu1 %v4671_v43 }
 0x24b   :  { %691 = vmatprep.subr.bf16.mxu0 %v4088_v14  ;;  %1110 = vmatprep.subr.bf16.mxu1 %v4682_v45  ;;  %v4696_v51 = vpack.c.bf16 %v324_v48, %v323_v47 }
 0x24c   :  { %664 = vmatprep.mubr.bf16.mxu0 %v5584_v38 }
 0x24d   :  { %3971 = vmatmul.mubr.bf16.gmra.mrb[4].mxu1 %v4696_v51 }
 0x24e   :  { %692 = vmatpush1.bf16.msra.mxu0 %v4086_v49  ;;  %1111 = vmatpush1.bf16.msra.mxu1 %v4693_v50 }
 0x24f   :  { %693 = vmatprep.subr.bf16.mxu0 %v4094_v52  ;;  %1112 = vmatprep.subr.bf16.mxu1 %v4704_v53 }
 0x250   :  { %1138 = vmatprep.mubr.bf16.mxu1 %v5584_v38 }
 0x251   :  { %665 = vmatmul.mubr.bf16.gmra.mrb[16].mxu0 %v4674_v44 }
 0x252   :  { %694 = vmatpush1.bf16.msra.mxu0 %v4092_v55  ;;  %1113 = vmatpush1.bf16.msra.mxu1 %v4715_v56 }
 0x253   :  { %695 = vmatprep.subr.bf16.mxu0 %v4100_v58  ;;  %1114 = vmatprep.subr.bf16.mxu1 %v4724_v59 }
 0x254   :  { %674 = vmatprep.mubr.bf16.mxu0 %v5584_v38 }
 0x256   :  { %696 = vmatpush1.bf16.msra.mxu0 %v4098_v60  ;;  %1115 = vmatpush1.bf16.msra.mxu1 %v4735_v62 }
 0x257   :  { %697 = vmatprep.subr.bf16.mxu0 %v4106_v0  ;;  %1116 = vmatprep.subr.bf16.mxu1 %v4744_v1 }
 0x259   :  { %675 = vmatmul.mubr.bf16.gmra.mrb[20].mxu0 %v4696_v51 }
 0x25a   :  { %698 = vmatpush1.bf16.msra.mxu0 %v4104_v2  ;;  %1117 = vmatpush1.bf16.msra.mxu1 %v4754_v3 }
 0x25b   :  { %699 = vmatprep.subr.bf16.mxu0 %v4112_v5  ;;  %1118 = vmatprep.subr.bf16.mxu1 %v4763_v6 }
 0x25c   :  { %717 = vmatprep.mubr.bf16.mxu0 %v5584_v38 }
 0x25e   :  { %700 = vmatpush1.bf16.msra.mxu0 %v4110_v8  ;;  %1119 = vmatpush1.bf16.msra.mxu1 %v4773_v9 }
 0x25f   :  { %1065 = vmatprep.subr.bf16.mxu0 %v4779_v10  ;;  %1120 = vmatprep.subr.bf16.mxu1 %v4784_v11 }
 0x261   :  { %718 = vmatmul.mubr.bf16.vlgmr.msra.gmra.mrb[24].mxu0 %v4634_v24  ;;  %v4865_v24 = vld [vmem:[%s5574_s9 + $0xa4] ss:$16 sps:$4 sm:$0xff]  }
 0x262   :  { %1066 = vmatpush1.bf16.msra.mxu0 %v4791_v13  ;;  %1121 = vmatpush1.bf16.msra.mxu1 %v4796_v15 }
 0x263   :  { %1067 = vmatprep.subr.bf16.mxu0 %v4806_v16  ;;  %727 = vmatprep.mubr.bf16.mxu0 %v5584_v38 }
 0x264   :  { %1417 = vmatprep.subr.bf16.mxu1 %v4617_v39 }
 0x265   :  { %1139 = vmatmul.mubr.bf16.vlgmr.msra.gmra.mrb[8].mxu1 %v872_v17 }
 0x266   :  { %1068 = vmatpush1.bf16.msra.mxu0 %v4814_v18  ;;  %1418 = vmatpush1.bf16.msra.mxu1 %v4648_v31 }
 0x267   :  { %1069 = vmatprep.subr.bf16.mxu0 %v4821_v19  ;;  %1419 = vmatprep.subr.bf16.mxu1 %v4660_v34 }
 0x268   :  { %1449 = vmatprep.mubr.bf16.mxu1 %v5584_v38 }
 0x269   :  { %728 = vmatmul.mubr.bf16.gmra.mrb[28].mxu0 %v4652_v33 }
 0x26a   :  { %1070 = vmatpush1.bf16.msra.mxu0 %v4828_v20  ;;  %737 = vmatprep.mubr.bf16.mxu0 %v5584_v38 }
 0x26b   :  { %1071 = vmatprep.subr.bf16.mxu0 %v4835_v21  ;;  %1420 = vmatpush1.bf16.msra.mxu1 %v4671_v43 }
 0x26c   :  { %1421 = vmatprep.subr.bf16.mxu1 %v4682_v45 }
 0x26e   :  { %1072 = vmatpush1.bf16.msra.mxu0 %v4844_v22 }
 0x26f   :  { %1073 = vmatprep.subr.bf16.mxu0 %v4851_v23  ;;  %1422 = vmatpush1.bf16.msra.mxu1 %v4693_v50 }
 0x270   :  { %1423 = vmatprep.subr.bf16.mxu1 %v4704_v53 }
 0x271   :  { %738 = vmatmul.mubr.bf16.gmra.mrb[32].mxu0 %v4674_v44 }
 0x272   :  { %1074 = vmatpush1.bf16.msra.mxu0 %v4859_v61  ;;  %747 = vmatprep.mubr.bf16.mxu0 %v5584_v38 }
 0x273   :  { %1075 = vmatprep.subr.bf16.mxu0 %v4865_v24  ;;  %1424 = vmatpush1.bf16.msra.mxu1 %v4715_v56 }
 0x274   :  { %1425 = vmatprep.subr.bf16.mxu1 %v4724_v59 }
 0x276   :  { %1076 = vmatpush1.bf16.msra.mxu0 %v4874_v57 }
 0x277   :  { %1077 = vmatprep.subr.bf16.mxu0 %v4881_v25  ;;  %1426 = vmatpush1.bf16.msra.mxu1 %v4735_v62 }
 0x278   :  { %1427 = vmatprep.subr.bf16.mxu1 %v4744_v1 }
 0x279   :  { %748 = vmatmul.mubr.bf16.gmra.mrb[36].mxu0 %v4696_v51 }
 0x27a   :  { %1078 = vmatpush1.bf16.msra.mxu0 %v4889_v26  ;;  %1097 = vmatprep.mubr.bf16.mxu0 %v5584_v38 }
 0x27b   :  { %1079 = vmatprep.subr.bf16.mxu0 %v4895_v27  ;;  %1428 = vmatpush1.bf16.msra.mxu1 %v4754_v3 }
 0x27c   :  { %1429 = vmatprep.subr.bf16.mxu1 %v4763_v6 }
 0x27e   :  { %1080 = vmatpush1.bf16.msra.mxu0 %v4904_v28 }
 0x27f   :  { %1376 = vmatprep.subr.bf16.mxu0 %v4779_v10  ;;  %1430 = vmatpush1.bf16.msra.mxu1 %v4773_v9 }
 0x280   :  { %1431 = vmatprep.subr.bf16.mxu1 %v4784_v11 }
 0x281   :  { %1098 = vmatmul.mubr.bf16.vlgmr.msra.gmra.mrb[40].mxu0 %v872_v17 }
 0x282   :  { %1377 = vmatpush1.bf16.msra.mxu0 %v4791_v13  ;;  %1408 = vmatprep.mubr.bf16.mxu0 %v5584_v38 }
 0x283   :  { %1378 = vmatprep.subr.bf16.mxu0 %v4806_v16  ;;  %1432 = vmatpush1.bf16.msra.mxu1 %v4796_v15 }
 0x284   :  { %1729 = vmatprep.subr.bf16.mxu1 %v4617_v39  ;;  %v379_v39 = vlaneseq }
 0x286   :  { %1379 = vmatpush1.bf16.msra.mxu0 %v4814_v18  ;;  %v4933_v63 = vshrl.u32 %v379_v39, 7 }
 0x287   :  { %1380 = vmatprep.subr.bf16.mxu0 %v4821_v19 }
 0x288   :  { %5587 = vst [vmem:[#allocation6_spill] sm:$0xff] %v4933_v63  ;;  %v381_v29 = vsub.s32 0, %v4933_v63  ;;  %v385_v4 = vsub.s32 1, %v4933_v63  ;;  %v389_v39 = vsub.s32 2, %v4933_v63 }
 0x28a   :  { %1381 = vmatpush1.bf16.msra.mxu0 %v4828_v20  ;;  %v4942_v33 = vrot.slane %v377_v30, %v381_v29  ;;  %v4946_v35 = vrot.slane %v377_v30, %v385_v4 }
 0x28b   :  { %1382 = vmatprep.subr.bf16.mxu0 %v4835_v21 }
 0x28e   :  { %1383 = vmatpush1.bf16.msra.mxu0 %v4844_v22 }
 0x28f   :  { %1384 = vmatprep.subr.bf16.mxu0 %v4851_v23 }
 0x292   :  { %1385 = vmatpush1.bf16.msra.mxu0 %v4859_v61 }
 0x293   :  { %1386 = vmatprep.subr.bf16.mxu0 %v4865_v24 }
 0x296   :  { %1387 = vmatpush1.bf16.msra.mxu0 %v4874_v57 }
 0x297   :  { %1388 = vmatprep.subr.bf16.mxu0 %v4881_v25 }
 0x29a   :  { %1389 = vmatpush1.bf16.msra.mxu0 %v4889_v26 }
 0x29b   :  { %1390 = vmatprep.subr.bf16.mxu0 %v4895_v27 }
 0x29e   :  { %1391 = vmatpush1.bf16.msra.mxu0 %v4904_v28 }
 0x29f   :  { %1688 = vmatprep.subr.bf16.mxu0 %v4779_v10 }
 0x314   :  { %v4940_v32 = vpop.f32.mrb[8].mxu0 }
 0x315   :  { %v4944_v7 = vpop.f32.mrb[9].mxu0 }
 0x316   :  { %v650_v36 = vpop.f32.mrb[10].mxu0 }
 0x317   :  { %v4949_v37 = vadd.f32 %v650_v36, %v4942_v33  ;;  %v652_v40 = vpop.f32.mrb[11].mxu0  ;;  %v393_v36 = vsub.s32 3, %v4933_v63 }
 0x318   :  { %v4952_v12 = vadd.f32 %v652_v40, %v4946_v35 }
 0x31c   :  { %v656_v41 = vpop.f32.mrb[12].mxu0 }
 0x31d   :  { %v4955_v42 = vadd.f32 %v656_v41, %v4942_v33  ;;  %v658_v44 = vpop.f32.mrb[13].mxu0 }
 0x31e   :  { %v4958_v14 = vadd.f32 %v658_v44, %v4946_v35  ;;  %v660_v46 = vpop.f32.mrb[14].mxu0 }
 0x31f   :  { %v4961_v47 = vadd.f32 %v660_v46, %v4942_v33  ;;  %v662_v48 = vpop.f32.mrb[15].mxu0  ;;  %v390_v46 = vrot.slane %v377_v30, %v389_v39 }
 0x320   :  { %v4964_v49 = vadd.f32 %v662_v48, %v4946_v35  ;;  %v394_v48 = vrot.slane %v377_v30, %v393_v36 }
 0x324   :  { %v666_v51 = vpop.f32.mrb[16].mxu0 }
 0x325   :  { %v4967_v52 = vadd.f32 %v666_v51, %v4942_v33  ;;  %v668_v55 = vpop.f32.mrb[17].mxu0 }
 0x326   :  { %v4970_v58 = vadd.f32 %v668_v55, %v4946_v35  ;;  %v670_v60 = vpop.f32.mrb[18].mxu0 }
 0x327   :  { %5588 = vst [vmem:[#allocation7_spill] sm:$0xff] %v4967_v52  ;;  %v4973_v0 = vadd.f32 %v670_v60, %v4942_v33  ;;  %v672_v2 = vpop.f32.mrb[19].mxu0 }
 0x328   :  { %5589 = vst [vmem:[#allocation8_spill] sm:$0xff] %v4970_v58  ;;  %v4976_v5 = vadd.f32 %v672_v2, %v4946_v35 }
 0x329   :  { %5590 = vst [vmem:[#allocation9_spill] sm:$0xff] %v4973_v0 }
 0x32a   :  { %5591 = vst [vmem:[#allocation10_spill] sm:$0xff] %v4976_v5 }
 0x32c   :  { %v676_v8 = vpop.f32.mrb[20].mxu0 }
 0x32d   :  { %v4979_v54 = vadd.f32 %v676_v8, %v4942_v33  ;;  %v678_v17 = vpop.f32.mrb[21].mxu0 }
 0x32e   :  { %v4983_v29 = vadd.f32 %v678_v17, %v4946_v35  ;;  %v680_v4 = vpop.f32.mrb[22].mxu0 }
 0x32f   :  { %5592 = vst [vmem:[#allocation11_spill] sm:$0xff] %v4979_v54  ;;  %v4987_v40 = vadd.f32 %v680_v4, %v4942_v33  ;;  %v682_v41 = vpop.f32.mrb[23].mxu0 }
 0x330   :  { %5593 = vst [vmem:[#allocation12_spill] sm:$0xff] %v4983_v29  ;;  %v4990_v44 = vadd.f32 %v682_v41, %v4946_v35 }
 0x331   :  { %5594 = vst [vmem:[#allocation13_spill] sm:$0xff] %v4987_v40 }
 0x332   :  { %5595 = vst [vmem:[#allocation14_spill] sm:$0xff] %v4990_v44 }
 0x334   :  { %v719_v51 = vpop.f32.mrb[24].mxu0 }
 0x335   :  { %v720_v55 = vadd.f32 %v719_v51, %v390_v46  ;;  %v721_v60 = vpop.f32.mrb[25].mxu0 }
 0x336   :  { %v722_v2 = vadd.f32 %v721_v60, %v394_v48  ;;  %v723_v8 = vpop.f32.mrb[26].mxu0 }
 0x337   :  { %v4992_v38 = vadd.f32 %v723_v8, %v390_v46  ;;  %v725_v17 = vpop.f32.mrb[27].mxu0 }
 0x338   :  { %v4994_v29 = vadd.f32 %v725_v17, %v394_v48  ;;  %v1140_v63 = vpop.f32.mrb[8].mxu1 }
 0x339   :  { %v1149_v54 = vadd.f32 %v1140_v63, %v720_v55  ;;  %v1142_v4 = vpop.f32.mrb[9].mxu1 }
 0x33a   :  { %v1150_v40 = vadd.f32 %v1142_v4, %v722_v2  ;;  %v1144_v5 = vpop.f32.mrb[10].mxu1 }
 0x33b   :  { %v1145_v0 = vpop.f32.mrb[11].mxu1 }
 0x33c   :  { %v729_v41 = vpop.f32.mrb[28].mxu0 }
 0x33d   :  { %v4996_v44 = vadd.f32 %v729_v41, %v390_v46  ;;  %v731_v30 = vpop.f32.mrb[29].mxu0 }
 0x33e   :  { %v4998_v39 = vadd.f32 %v731_v30, %v394_v48  ;;  %v733_v36 = vpop.f32.mrb[30].mxu0 }
 0x33f   :  { %v5000_v51 = vadd.f32 %v733_v36, %v390_v46  ;;  %v735_v60 = vpop.f32.mrb[31].mxu0 }
 0x340   :  { %v5002_v8 = vadd.f32 %v735_v60, %v394_v48 }
 0x342   :  { %5596 = vst [vmem:[#allocation15_spill] sm:$0xff] %v5002_v8 }
 0x344   :  { %v739_v17 = vpop.f32.mrb[32].mxu0 }
 0x345   :  { %v5004_v58 = vadd.f32 %v739_v17, %v390_v46  ;;  %v741_v63 = vpop.f32.mrb[33].mxu0 }
 0x346   :  { %v5006_v55 = vadd.f32 %v741_v63, %v394_v48  ;;  %v743_v5 = vpop.f32.mrb[34].mxu0  ;;  %v647_v63 = vadd.f32 %v4940_v32, %v4942_v33 }
 0x347   :  { %5597 = vst [vmem:[#allocation16_spill] sm:$0xff] %v5004_v58  ;;  %v5008_v0 = vadd.f32 %v743_v5, %v390_v46  ;;  %v745_v2 = vpop.f32.mrb[35].mxu0  ;;  %v649_v5 = vadd.f32 %v4944_v7, %v4946_v35  ;;  %v48_v35 = vld [vmem:[%s5579_s2] sm:$0xff] }
 0x348   :  { %5598 = vst [vmem:[#allocation17_spill] sm:$0xff] %v5006_v55  ;;  %v5010_v4 = vadd.f32 %v745_v2, %v394_v48 }
 0x349   :  { %5599 = vst [vmem:[#allocation18_spill] sm:$0xff] %v5008_v0 }
 0x34a   :  { %5600 = vst [vmem:[#allocation19_spill] sm:$0xff] %v5010_v4 }
 0x34c   :  { %v749_v41 = vpop.f32.mrb[36].mxu0 }
 0x34d   :  { %v5012_v30 = vadd.f32 %v749_v41, %v390_v46  ;;  %v751_v36 = vpop.f32.mrb[37].mxu0 }
 0x34e   :  { %v5014_v52 = vadd.f32 %v751_v36, %v394_v48  ;;  %v753_v60 = vpop.f32.mrb[38].mxu0 }
 0x34f   :  { %5601 = vst [vmem:[#allocation20_spill] sm:$0xff] %v5012_v30  ;;  %v5016_v8 = vadd.f32 %v753_v60, %v390_v46  ;;  %v755_v17 = vpop.f32.mrb[39].mxu0  ;;  %v3636_v46 = vmul.f32 -1.442695, %v1150_v40 }
 0x350   :  { %5602 = vst [vmem:[#allocation21_spill] sm:$0xff] %v5014_v52  ;;  %v5018_v58 = vadd.f32 %v755_v17, %v394_v48 }
 0x354   :  { %v1099_v2 = vpop.f32.mrb[40].mxu0 }
 0x355   :  { %v1147_v4 = vadd.f32 %v1099_v2, %v647_v63  ;;  %v1101_v0 = vpop.f32.mrb[41].mxu0 }
 0x356   :  { %v1148_v41 = vadd.f32 %v1101_v0, %v649_v5  ;;  %v1103_v30 = vpop.f32.mrb[42].mxu0 }
 0x357   :  { %v3634_v55 = vmul.f32 -1.442695, %v1147_v4  ;;  %v1104_v36 = vpop.f32.mrb[43].mxu0 }
 0x358   :  { %v3635_v52 = vmul.f32 -1.442695, %v1148_v41  ;;  %v5603_v41 = vmov 0  }
 0x359   :  { %4255 = vpow2.f32 %v3634_v55 }
 0x35a   :  { %4257 = vpow2.f32 %v3635_v52 }
 0x35b   :  { %4259 = vpow2.f32 %v3636_v46 }
 0x35c   :  { %4261 = vtanh.f32 %v1149_v54 }
 0x363   :  { %v4256_v60 = vpop.eup %4255 }
 0x364   :  { %v4258_v48 = vpop.eup %4257  ;;  %v1154_v17 = vadd.f32 1.0, %v4256_v60 }
 0x365   :  { %v1160_v32 = vadd.f32 1.0, %v4258_v48  ;;  %v4260_v33 = vpop.eup %4259 }
 0x366   :  { %4263 = vrcp.f32 %v1154_v17  ;;  %v4262_v7 = vpop.eup %4261  ;;  %v1167_v30 = vadd.f32 1.0, %v4260_v33 }
 0x367   :  { %4265 = vrcp.f32 %v1160_v32 }
 0x368   :  { %4267 = vrcp.f32 %v1167_v30  ;;  %v5188_v30 = vld [vmem:[%s5574_s9 + $0xe8] ss:$16 sps:$4 sm:$0xff]  }
 0x370   :  { %v4264_v0 = vpop.eup %4263 }
 0x371   :  { %v4266_v4 = vpop.eup %4265  ;;  %v1171_v55 = vmul.f32 %v4264_v0, %v4262_v7 }
 0x372   :  { %v1170_v52 = vmul.f32 %v4266_v4, %v48_v35  ;;  %v4268_v54 = vpop.eup %4267 }
 0x374   :  { %v5027_v40 = vadd.f32 %v1171_v55, %v1170_v52 }
 0x376   :  { %4269 = vtanh.f32 %v5027_v40 }
 0x380   :  { %v4270_v63 = vpop.eup %4269 }
 0x381   :  { %v5030_v5 = vmul.f32 %v4270_v63, %v4268_v54 }
 0x383   :  { %v1183_v2 = vpack.c.bf16 %v5030_v5, %v5030_v5 }
 0x385   :  { %1409 = vmatmul.mubr.bf16.vlgmr.msra.gmra.mrb[44].mxu0 %v1183_v2  ;;  %1450 = vmatmul.mubr.bf16.vlgmr.msra.gmra.mrb[12].mxu1 %v1183_v2 }
 0x386   :  { %1689 = vmatpush1.bf16.msra.mxu0 %v4791_v13  ;;  %1730 = vmatpush1.bf16.msra.mxu1 %v4648_v31 }
 0x387   :  { %1690 = vmatprep.subr.bf16.mxu0 %v4806_v16  ;;  %1731 = vmatprep.subr.bf16.mxu1 %v4660_v34 }
 0x388   :  { %1720 = vmatprep.mubr.bf16.mxu0 %v5603_v41  ;;  %1761 = vmatprep.mubr.bf16.mxu1 %v5603_v41 }
 0x38a   :  { %1691 = vmatpush1.bf16.msra.mxu0 %v4814_v18  ;;  %1732 = vmatpush1.bf16.msra.mxu1 %v4671_v43 }
 0x38b   :  { %1692 = vmatprep.subr.bf16.mxu0 %v4821_v19  ;;  %1733 = vmatprep.subr.bf16.mxu1 %v4682_v45 }
 0x38e   :  { %1693 = vmatpush1.bf16.msra.mxu0 %v4828_v20  ;;  %1734 = vmatpush1.bf16.msra.mxu1 %v4693_v50 }
 0x38f   :  { %1694 = vmatprep.subr.bf16.mxu0 %v4835_v21  ;;  %1735 = vmatprep.subr.bf16.mxu1 %v4704_v53 }
 0x392   :  { %1695 = vmatpush1.bf16.msra.mxu0 %v4844_v22  ;;  %1736 = vmatpush1.bf16.msra.mxu1 %v4715_v56 }
 0x393   :  { %1696 = vmatprep.subr.bf16.mxu0 %v4851_v23  ;;  %1737 = vmatprep.subr.bf16.mxu1 %v4724_v59 }
 0x396   :  { %1697 = vmatpush1.bf16.msra.mxu0 %v4859_v61  ;;  %1738 = vmatpush1.bf16.msra.mxu1 %v4735_v62 }
 0x397   :  { %1698 = vmatprep.subr.bf16.mxu0 %v4865_v24  ;;  %1739 = vmatprep.subr.bf16.mxu1 %v4744_v1 }
 0x39a   :  { %1699 = vmatpush1.bf16.msra.mxu0 %v4874_v57  ;;  %1740 = vmatpush1.bf16.msra.mxu1 %v4754_v3 }
 0x39b   :  { %1700 = vmatprep.subr.bf16.mxu0 %v4881_v25  ;;  %1741 = vmatprep.subr.bf16.mxu1 %v4763_v6 }
 0x39e   :  { %1701 = vmatpush1.bf16.msra.mxu0 %v4889_v26  ;;  %1742 = vmatpush1.bf16.msra.mxu1 %v4773_v9 }
 0x39f   :  { %1702 = vmatprep.subr.bf16.mxu0 %v4895_v27  ;;  %1743 = vmatprep.subr.bf16.mxu1 %v4784_v11 }
 0x3a2   :  { %1703 = vmatpush1.bf16.msra.mxu0 %v4904_v28  ;;  %1744 = vmatpush1.bf16.msra.mxu1 %v4796_v15 }
 0x3a3   :  { %2000 = vmatprep.subr.bf16.mxu0 %v4779_v10 }
 0x458   :  { %v1410_v31 = vpop.f32.mrb[44].mxu0  ;;  %v1451_v34 = vpop.f32.mrb[12].mxu1 }
 0x459   :  { %v1458_v43 = vadd.f32 %v1410_v31, %v4949_v37  ;;  %v1460_v45 = vadd.f32 %v1451_v34, %v4992_v38  ;;  %v1412_v50 = vpop.f32.mrb[45].mxu0  ;;  %v1453_v53 = vpop.f32.mrb[13].mxu1 }
 0x45a   :  { %v1459_v56 = vadd.f32 %v1412_v50, %v4952_v12  ;;  %v1461_v59 = vadd.f32 %v1453_v53, %v4994_v29  ;;  %v1414_v62 = vpop.f32.mrb[46].mxu0  ;;  %v1455_v1 = vpop.f32.mrb[14].mxu1 }
 0x45b   :  { %v3669_v3 = vmul.f32 -1.442695, %v1458_v43  ;;  %v1415_v6 = vpop.f32.mrb[47].mxu0  ;;  %v1456_v9 = vpop.f32.mrb[15].mxu1 }
 0x45c   :  { %v3670_v11 = vmul.f32 -1.442695, %v1459_v56  ;;  %v3671_v10 = vmul.f32 -1.442695, %v1461_v59 }
 0x45d   :  { %4271 = vpow2.f32 %v3669_v3 }
 0x45e   :  { %4273 = vpow2.f32 %v3670_v11 }
 0x45f   :  { %4275 = vpow2.f32 %v3671_v10 }
 0x460   :  { %4277 = vtanh.f32 %v1460_v45 }
 0x467   :  { %v4272_v15 = vpop.eup %4271 }
 0x468   :  { %v4274_v36 = vpop.eup %4273  ;;  %v1465_v37 = vadd.f32 1.0, %v4272_v15 }
 0x469   :  { %v1471_v38 = vadd.f32 1.0, %v4274_v36  ;;  %v4276_v12 = vpop.eup %4275 }
 0x46a   :  { %4279 = vrcp.f32 %v1465_v37  ;;  %v4278_v46 = vpop.eup %4277  ;;  %v1478_v17 = vadd.f32 1.0, %v4276_v12 }
 0x46b   :  { %4281 = vrcp.f32 %v1471_v38 }
 0x46c   :  { %4283 = vrcp.f32 %v1478_v17  ;;  %v5243_v17 = vld [vmem:[%s5574_s9 + $0x20] ss:$16 sps:$4 sm:$0xff]  }
 0x474   :  { %v4280_v29 = vpop.eup %4279 }
 0x475   :  { %v4282_v60 = vpop.eup %4281  ;;  %v1482_v48 = vmul.f32 %v4280_v29, %v4278_v46  ;;  %v5226_v29 = vld [vmem:[%s5574_s9 + $0x4] ss:$16 sps:$4 sm:$0xff]  }
 0x476   :  { %v1481_v32 = vmul.f32 %v4282_v60, %v5027_v40  ;;  %v4284_v7 = vpop.eup %4283  ;;  %v5231_v60 = vld [vmem:[%s5574_s9] ss:$16 sps:$4 sm:$0xff]  }
 0x478   :  { %v5072_v33 = vadd.f32 %v1482_v48, %v1481_v32  ;;  %v5238_v48 = vld [vmem:[%s5574_s9 + $0x24] ss:$16 sps:$4 sm:$0xff]  }
 0x479   :  { %v5250_v32 = vld [vmem:[%s5574_s9 + $0x44] ss:$16 sps:$4 sm:$0xff]  }
 0x47a   :  { %4285 = vtanh.f32 %v5072_v33 }
 0x484   :  { %v4286_v35 = vpop.eup %4285 }
 0x485   :  { %v5075_v0 = vmul.f32 %v4286_v35, %v4284_v7  ;;  %v5262_v7 = vld [vmem:[%s5574_s9 + $0x64] ss:$16 sps:$4 sm:$0xff]   ;;  %v5267_v35 = vld [vmem:[%s5574_s9 + $0x60] ss:$16 sps:$4 sm:$0xff]  }
 0x487   :  { %v1495_v4 = vpack.c.bf16 %v5075_v0, %v5075_v0 }
 0x489   :  { %1721 = vmatmul.mubr.bf16.vlgmr.msra.gmra.mrb[48].mxu0 %v1495_v4  ;;  %1762 = vmatmul.mubr.bf16.vlgmr.msra.gmra.mrb[16].mxu1 %v1495_v4  ;;  %v5274_v4 = vld [vmem:[%s5574_s9 + $0x84] ss:$16 sps:$4 sm:$0xff]  }
 0x48a   :  { %2001 = vmatpush1.bf16.msra.mxu0 %v4791_v13  ;;  %2032 = vmatprep.mubr.bf16.mxu0 %v5603_v41  ;;  %v5099_v13 = vld [vmem:[%s5574_s9 + $0xc] ss:$16 sps:$4 sm:$0xff]  }
 0x48b   :  { %2002 = vmatprep.subr.bf16.mxu0 %v4806_v16  ;;  %2073 = vmatprep.mubr.bf16.mxu1 %v5603_v41  ;;  %v5104_v16 = vld [vmem:[%s5574_s9 + $0x8] ss:$16 sps:$4 sm:$0xff]  }
 0x48c   :  { %2041 = vmatprep.subr.bf16.mxu1 %v5099_v13 }
 0x48d   :  { %2042 = vmatpush1.bf16.msra.mxu1 %v5104_v16 }
 0x48e   :  { %2003 = vmatpush1.bf16.msra.mxu0 %v4814_v18  ;;  %v5111_v18 = vld [vmem:[%s5574_s9 + $0x2c] ss:$16 sps:$4 sm:$0xff]  }
 0x48f   :  { %2004 = vmatprep.subr.bf16.mxu0 %v4821_v19  ;;  %v5116_v19 = vld [vmem:[%s5574_s9 + $0x28] ss:$16 sps:$4 sm:$0xff]   ;;  %2043 = vmatprep.subr.bf16.mxu1 %v5111_v18 }
 0x491   :  { %2044 = vmatpush1.bf16.msra.mxu1 %v5116_v19 }
 0x492   :  { %2005 = vmatpush1.bf16.msra.mxu0 %v4828_v20  ;;  %v5123_v20 = vld [vmem:[%s5574_s9 + $0x4c] ss:$16 sps:$4 sm:$0xff]  }
 0x493   :  { %2006 = vmatprep.subr.bf16.mxu0 %v4835_v21  ;;  %v5128_v21 = vld [vmem:[%s5574_s9 + $0x48] ss:$16 sps:$4 sm:$0xff]   ;;  %2045 = vmatprep.subr.bf16.mxu1 %v5123_v20 }
 0x495   :  { %2046 = vmatpush1.bf16.msra.mxu1 %v5128_v21 }
 0x496   :  { %2007 = vmatpush1.bf16.msra.mxu0 %v4844_v22  ;;  %v5135_v22 = vld [vmem:[%s5574_s9 + $0x6c] ss:$16 sps:$4 sm:$0xff]  }
 0x497   :  { %2008 = vmatprep.subr.bf16.mxu0 %v4851_v23  ;;  %v5140_v23 = vld [vmem:[%s5574_s9 + $0x68] ss:$16 sps:$4 sm:$0xff]   ;;  %2047 = vmatprep.subr.bf16.mxu1 %v5135_v22 }
 0x499   :  { %2048 = vmatpush1.bf16.msra.mxu1 %v5140_v23 }
 0x49a   :  { %2009 = vmatpush1.bf16.msra.mxu0 %v4859_v61  ;;  %v5147_v61 = vld [vmem:[%s5574_s9 + $0x8c] ss:$16 sps:$4 sm:$0xff]  }
 0x49b   :  { %2010 = vmatprep.subr.bf16.mxu0 %v4865_v24  ;;  %v5152_v24 = vld [vmem:[%s5574_s9 + $0x88] ss:$16 sps:$4 sm:$0xff]   ;;  %2049 = vmatprep.subr.bf16.mxu1 %v5147_v61 }
 0x49d   :  { %2050 = vmatpush1.bf16.msra.mxu1 %v5152_v24 }
 0x49e   :  { %2011 = vmatpush1.bf16.msra.mxu0 %v4874_v57  ;;  %v5158_v57 = vld [vmem:[%s5574_s9 + $0xac] ss:$16 sps:$4 sm:$0xff]  }
 0x49f   :  { %2012 = vmatprep.subr.bf16.mxu0 %v4881_v25  ;;  %v5164_v25 = vld [vmem:[%s5574_s9 + $0xa8] ss:$16 sps:$4 sm:$0xff]   ;;  %2051 = vmatprep.subr.bf16.mxu1 %v5158_v57 }
 0x4a1   :  { %2052 = vmatpush1.bf16.msra.mxu1 %v5164_v25 }
 0x4a2   :  { %2013 = vmatpush1.bf16.msra.mxu0 %v4889_v26  ;;  %v5170_v26 = vld [vmem:[%s5574_s9 + $0xcc] ss:$16 sps:$4 sm:$0xff]  }
 0x4a3   :  { %2014 = vmatprep.subr.bf16.mxu0 %v4895_v27  ;;  %v5176_v27 = vld [vmem:[%s5574_s9 + $0xc8] ss:$16 sps:$4 sm:$0xff]   ;;  %2053 = vmatprep.subr.bf16.mxu1 %v5170_v26 }
 0x4a5   :  { %2054 = vmatpush1.bf16.msra.mxu1 %v5176_v27 }
 0x4a6   :  { %2015 = vmatpush1.bf16.msra.mxu0 %v4904_v28  ;;  %v5182_v28 = vld [vmem:[%s5574_s9 + $0xec] ss:$16 sps:$4 sm:$0xff]  }
 0x4a7   :  { %2055 = vmatprep.subr.bf16.mxu1 %v5182_v28  ;;  %2312 = vmatprep.subr.bf16.mxu0 %v5226_v29 }
 0x4a9   :  { %2056 = vmatpush1.bf16.msra.mxu1 %v5188_v30 }
 0x4aa   :  { %2353 = vmatprep.subr.bf16.mxu1 %v5099_v13 }
 0x55c   :  { %v1722_v55 = vpop.f32.mrb[48].mxu0  ;;  %v1763_v52 = vpop.f32.mrb[16].mxu1 }
 0x55d   :  { %v1770_v40 = vadd.f32 %v1722_v55, %v4955_v42  ;;  %v1772_v54 = vadd.f32 %v1763_v52, %v4996_v44  ;;  %v1724_v63 = vpop.f32.mrb[49].mxu0  ;;  %v1765_v2 = vpop.f32.mrb[17].mxu1  ;;  %v5279_v55 = vld [vmem:[%s5574_s9 + $0x80] ss:$16 sps:$4 sm:$0xff]   ;;  %v5285_v52 = vld [vmem:[%s5574_s9 + $0xa4] ss:$16 sps:$4 sm:$0xff]  }
 0x55e   :  { %v1771_v31 = vadd.f32 %v1724_v63, %v4958_v14  ;;  %v1773_v34 = vadd.f32 %v1765_v2, %v4998_v39  ;;  %v1726_v43 = vpop.f32.mrb[50].mxu0  ;;  %v1767_v45 = vpop.f32.mrb[18].mxu1  ;;  %v5303_v63 = vld [vmem:[%s5574_s9 + $0xc0] ss:$16 sps:$4 sm:$0xff]   ;;  %v5309_v2 = vld [vmem:[%s5574_s9 + $0xe4] ss:$16 sps:$4 sm:$0xff]  }
 0x55f   :  { %v3704_v50 = vmul.f32 -1.442695, %v1770_v40  ;;  %v1727_v53 = vpop.f32.mrb[51].mxu0  ;;  %v1768_v56 = vpop.f32.mrb[19].mxu1  ;;  %v5291_v40 = vld [vmem:[%s5574_s9 + $0xa0] ss:$16 sps:$4 sm:$0xff]  }
 0x560   :  { %v3705_v59 = vmul.f32 -1.442695, %v1771_v31  ;;  %v3706_v62 = vmul.f32 -1.442695, %v1773_v34  ;;  %v5315_v31 = vld [vmem:[%s5574_s9 + $0xe0] ss:$16 sps:$4 sm:$0xff]  }
 0x561   :  { %4287 = vpow2.f32 %v3704_v50 }
 0x562   :  { %4289 = vpow2.f32 %v3705_v59 }
 0x563   :  { %4291 = vpow2.f32 %v3706_v62  ;;  %v5604_v62 = vld [vmem:[#allocation15_spill] sm:$0xff] }
 0x564   :  { %4293 = vtanh.f32 %v1772_v54  ;;  %v5297_v54 = vld [vmem:[%s5574_s9 + $0xc4] ss:$16 sps:$4 sm:$0xff]  }
 0x56b   :  { %v4288_v1 = vpop.eup %4287 }
 0x56c   :  { %v4290_v3 = vpop.eup %4289  ;;  %v1777_v42 = vadd.f32 1.0, %v4288_v1 }
 0x56d   :  { %v1783_v44 = vadd.f32 1.0, %v4290_v3  ;;  %v4292_v14 = vpop.eup %4291 }
 0x56e   :  { %4295 = vrcp.f32 %v1777_v42  ;;  %v4294_v6 = vpop.eup %4293  ;;  %v1790_v10 = vadd.f32 1.0, %v4292_v14 }
 0x56f   :  { %4297 = vrcp.f32 %v1783_v44 }
 0x570   :  { %4299 = vrcp.f32 %v1790_v10 }
 0x578   :  { %v4296_v39 = vpop.eup %4295 }
 0x579   :  { %v4298_v9 = vpop.eup %4297  ;;  %v1794_v11 = vmul.f32 %v4296_v39, %v4294_v6 }
 0x57a   :  { %v1793_v15 = vmul.f32 %v4298_v9, %v5072_v33  ;;  %v4300_v37 = vpop.eup %4299  ;;  %v5255_v33 = vld [vmem:[%s5574_s9 + $0x40] ss:$16 sps:$4 sm:$0xff]  }
 0x57c   :  { %v5198_v36 = vadd.f32 %v1794_v11, %v1793_v15 }
 0x57e   :  { %4301 = vtanh.f32 %v5198_v36 }
 0x588   :  { %v4302_v38 = vpop.eup %4301 }
 0x589   :  { %v5201_v12 = vmul.f32 %v4302_v38, %v4300_v37 }
 0x58b   :  { %v1807_v46 = vpack.c.bf16 %v5201_v12, %v5201_v12 }
 0x58d   :  { %2033 = vmatmul.mubr.bf16.vlgmr.msra.gmra.mrb[52].mxu0 %v1807_v46  ;;  %2074 = vmatmul.mubr.bf16.vlgmr.msra.gmra.mrb[20].mxu1 %v1807_v46 }
 0x58e   :  { %2354 = vmatpush1.bf16.msra.mxu1 %v5104_v16  ;;  %2344 = vmatprep.mubr.bf16.mxu0 %v5603_v41 }
 0x58f   :  { %2355 = vmatprep.subr.bf16.mxu1 %v5111_v18  ;;  %2385 = vmatprep.mubr.bf16.mxu1 %v5603_v41 }
 0x590   :  { %2313 = vmatpush1.bf16.msra.mxu0 %v5231_v60 }
 0x591   :  { %2314 = vmatprep.subr.bf16.mxu0 %v5238_v48 }
 0x592   :  { %2356 = vmatpush1.bf16.msra.mxu1 %v5116_v19 }
 0x593   :  { %2357 = vmatprep.subr.bf16.mxu1 %v5123_v20 }
 0x594   :  { %2315 = vmatpush1.bf16.msra.mxu0 %v5243_v17 }
 0x595   :  { %2316 = vmatprep.subr.bf16.mxu0 %v5250_v32 }
 0x596   :  { %2358 = vmatpush1.bf16.msra.mxu1 %v5128_v21 }
 0x597   :  { %2359 = vmatprep.subr.bf16.mxu1 %v5135_v22 }
 0x598   :  { %2317 = vmatpush1.bf16.msra.mxu0 %v5255_v33 }
 0x599   :  { %2318 = vmatprep.subr.bf16.mxu0 %v5262_v7 }
 0x59a   :  { %2360 = vmatpush1.bf16.msra.mxu1 %v5140_v23 }
 0x59b   :  { %2361 = vmatprep.subr.bf16.mxu1 %v5147_v61 }
 0x59c   :  { %2319 = vmatpush1.bf16.msra.mxu0 %v5267_v35 }
 0x59d   :  { %2320 = vmatprep.subr.bf16.mxu0 %v5274_v4 }
 0x59e   :  { %2362 = vmatpush1.bf16.msra.mxu1 %v5152_v24 }
 0x59f   :  { %2363 = vmatprep.subr.bf16.mxu1 %v5158_v57 }
 0x5a0   :  { %2321 = vmatpush1.bf16.msra.mxu0 %v5279_v55 }
 0x5a1   :  { %2322 = vmatprep.subr.bf16.mxu0 %v5285_v52 }
 0x5a2   :  { %2364 = vmatpush1.bf16.msra.mxu1 %v5164_v25 }
 0x5a3   :  { %2365 = vmatprep.subr.bf16.mxu1 %v5170_v26 }
 0x5a4   :  { %2323 = vmatpush1.bf16.msra.mxu0 %v5291_v40 }
 0x5a5   :  { %2324 = vmatprep.subr.bf16.mxu0 %v5297_v54 }
 0x5a6   :  { %2366 = vmatpush1.bf16.msra.mxu1 %v5176_v27 }
 0x5a7   :  { %2367 = vmatprep.subr.bf16.mxu1 %v5182_v28 }
 0x5a8   :  { %2325 = vmatpush1.bf16.msra.mxu0 %v5303_v63 }
 0x5a9   :  { %2326 = vmatprep.subr.bf16.mxu0 %v5309_v2 }
 0x5aa   :  { %2368 = vmatpush1.bf16.msra.mxu1 %v5188_v30 }
 0x5ab   :  { %2665 = vmatprep.subr.bf16.mxu1 %v5099_v13 }
 0x5ac   :  { %2327 = vmatpush1.bf16.msra.mxu0 %v5315_v31 }
 0x5ad   :  { %2624 = vmatprep.subr.bf16.mxu0 %v5226_v29 }
 0x660   :  { %v2034_v34 = vpop.f32.mrb[52].mxu0  ;;  %v2075_v43 = vpop.f32.mrb[20].mxu1 }
 0x661   :  { %v2082_v45 = vadd.f32 %v2034_v34, %v4961_v47  ;;  %v2084_v50 = vadd.f32 %v2075_v43, %v5000_v51  ;;  %v2036_v53 = vpop.f32.mrb[53].mxu0  ;;  %v2077_v56 = vpop.f32.mrb[21].mxu1 }
 0x662   :  { %v2083_v59 = vadd.f32 %v2036_v53, %v4964_v49  ;;  %v2085_v1 = vadd.f32 %v2077_v56, %v5604_v62  ;;  %v2038_v3 = vpop.f32.mrb[54].mxu0  ;;  %v2079_v42 = vpop.f32.mrb[22].mxu1 }
 0x663   :  { %v3739_v44 = vmul.f32 -1.442695, %v2082_v45  ;;  %v2039_v14 = vpop.f32.mrb[55].mxu0  ;;  %v2080_v6 = vpop.f32.mrb[23].mxu1  ;;  %v5606_v42 = vld [vmem:[#allocation16_spill] sm:$0xff] }
 0x664   :  { %v3740_v39 = vmul.f32 -1.442695, %v2083_v59  ;;  %v3741_v9 = vmul.f32 -1.442695, %v2085_v1  ;;  %v5605_v1 = vld [vmem:[#allocation7_spill] sm:$0xff] }
 0x665   :  { %4303 = vpow2.f32 %v3739_v44 }
 0x666   :  { %4305 = vpow2.f32 %v3740_v39  ;;  %v5607_v39 = vld [vmem:[#allocation8_spill] sm:$0xff] }
 0x667   :  { %4307 = vpow2.f32 %v3741_v9 }
 0x668   :  { %4309 = vtanh.f32 %v2084_v50 }
 0x66f   :  { %v4304_v11 = vpop.eup %4303 }
 0x670   :  { %v4306_v10 = vpop.eup %4305  ;;  %v2089_v47 = vadd.f32 1.0, %v4304_v11  ;;  %v5608_v11 = vld [vmem:[#allocation17_spill] sm:$0xff] }
 0x671   :  { %v2095_v51 = vadd.f32 1.0, %v4306_v10  ;;  %v4308_v49 = vpop.eup %4307 }
 0x672   :  { %4311 = vrcp.f32 %v2089_v47  ;;  %v4310_v15 = vpop.eup %4309  ;;  %v2102_v34 = vadd.f32 1.0, %v4308_v49 }
 0x673   :  { %4313 = vrcp.f32 %v2095_v51 }
 0x674   :  { %4315 = vrcp.f32 %v2102_v34 }
 0x67c   :  { %v4312_v37 = vpop.eup %4311 }
 0x67d   :  { %v4314_v38 = vpop.eup %4313  ;;  %v2106_v46 = vmul.f32 %v4312_v37, %v4310_v15 }
 0x67e   :  { %v2105_v43 = vmul.f32 %v4314_v38, %v5198_v36  ;;  %v4316_v53 = vpop.eup %4315 }
 0x680   :  { %v5325_v45 = vadd.f32 %v2106_v46, %v2105_v43 }
 0x682   :  { %4317 = vtanh.f32 %v5325_v45 }
 0x68c   :  { %v4318_v56 = vpop.eup %4317 }
 0x68d   :  { %v5328_v59 = vmul.f32 %v4318_v56, %v4316_v53 }
 0x68f   :  { %v2119_v50 = vpack.c.bf16 %v5328_v59, %v5328_v59 }
 0x691   :  { %2345 = vmatmul.mubr.bf16.vlgmr.msra.gmra.mrb[56].mxu0 %v2119_v50  ;;  %2386 = vmatmul.mubr.bf16.vlgmr.msra.gmra.mrb[24].mxu1 %v2119_v50 }
 0x692   :  { %2625 = vmatpush1.bf16.msra.mxu0 %v5231_v60  ;;  %2666 = vmatpush1.bf16.msra.mxu1 %v5104_v16 }
 0x693   :  { %2626 = vmatprep.subr.bf16.mxu0 %v5238_v48  ;;  %2667 = vmatprep.subr.bf16.mxu1 %v5111_v18 }
 0x694   :  { %2656 = vmatprep.mubr.bf16.mxu0 %v5603_v41  ;;  %2697 = vmatprep.mubr.bf16.mxu1 %v5603_v41 }
 0x696   :  { %2627 = vmatpush1.bf16.msra.mxu0 %v5243_v17  ;;  %2668 = vmatpush1.bf16.msra.mxu1 %v5116_v19 }
 0x697   :  { %2628 = vmatprep.subr.bf16.mxu0 %v5250_v32  ;;  %2669 = vmatprep.subr.bf16.mxu1 %v5123_v20 }
 0x69a   :  { %2629 = vmatpush1.bf16.msra.mxu0 %v5255_v33  ;;  %2670 = vmatpush1.bf16.msra.mxu1 %v5128_v21 }
 0x69b   :  { %2630 = vmatprep.subr.bf16.mxu0 %v5262_v7  ;;  %2671 = vmatprep.subr.bf16.mxu1 %v5135_v22 }
 0x69e   :  { %2631 = vmatpush1.bf16.msra.mxu0 %v5267_v35  ;;  %2672 = vmatpush1.bf16.msra.mxu1 %v5140_v23 }
 0x69f   :  { %2632 = vmatprep.subr.bf16.mxu0 %v5274_v4  ;;  %2673 = vmatprep.subr.bf16.mxu1 %v5147_v61 }
 0x6a2   :  { %2633 = vmatpush1.bf16.msra.mxu0 %v5279_v55  ;;  %2674 = vmatpush1.bf16.msra.mxu1 %v5152_v24 }
 0x6a3   :  { %2634 = vmatprep.subr.bf16.mxu0 %v5285_v52  ;;  %2675 = vmatprep.subr.bf16.mxu1 %v5158_v57 }
 0x6a6   :  { %2635 = vmatpush1.bf16.msra.mxu0 %v5291_v40  ;;  %2676 = vmatpush1.bf16.msra.mxu1 %v5164_v25 }
 0x6a7   :  { %2636 = vmatprep.subr.bf16.mxu0 %v5297_v54  ;;  %2677 = vmatprep.subr.bf16.mxu1 %v5170_v26 }
 0x6aa   :  { %2637 = vmatpush1.bf16.msra.mxu0 %v5303_v63  ;;  %2678 = vmatpush1.bf16.msra.mxu1 %v5176_v27 }
 0x6ab   :  { %2638 = vmatprep.subr.bf16.mxu0 %v5309_v2  ;;  %2679 = vmatprep.subr.bf16.mxu1 %v5182_v28 }
 0x6ae   :  { %2639 = vmatpush1.bf16.msra.mxu0 %v5315_v31  ;;  %2680 = vmatpush1.bf16.msra.mxu1 %v5188_v30 }
 0x6af   :  { %2936 = vmatprep.subr.bf16.mxu0 %v5226_v29  ;;  %2977 = vmatprep.subr.bf16.mxu1 %v5099_v13 }
 0x764   :  { %v2346_v36 = vpop.f32.mrb[56].mxu0  ;;  %v2387_v62 = vpop.f32.mrb[24].mxu1 }
 0x765   :  { %v2394_v3 = vadd.f32 %v2346_v36, %v5605_v1  ;;  %v2396_v44 = vadd.f32 %v2387_v62, %v5606_v42  ;;  %v2348_v14 = vpop.f32.mrb[57].mxu0  ;;  %v2389_v6 = vpop.f32.mrb[25].mxu1 }
 0x766   :  { %v2395_v9 = vadd.f32 %v2348_v14, %v5607_v39  ;;  %v2397_v10 = vadd.f32 %v2389_v6, %v5608_v11  ;;  %v2350_v47 = vpop.f32.mrb[58].mxu0  ;;  %v2391_v51 = vpop.f32.mrb[26].mxu1 }
 0x767   :  { %v3774_v49 = vmul.f32 -1.442695, %v2394_v3  ;;  %v2351_v15 = vpop.f32.mrb[59].mxu0  ;;  %v2392_v37 = vpop.f32.mrb[27].mxu1 }
 0x768   :  { %v3775_v38 = vmul.f32 -1.442695, %v2395_v9  ;;  %v3776_v13 = vmul.f32 -1.442695, %v2397_v10 }
 0x769   :  { %4319 = vpow2.f32 %v3774_v49 }
 0x76a   :  { %4321 = vpow2.f32 %v3775_v38 }
 0x76b   :  { %4323 = vpow2.f32 %v3776_v13 }
 0x76c   :  { %4325 = vtanh.f32 %v2396_v44 }
 0x773   :  { %v4320_v46 = vpop.eup %4319 }
 0x774   :  { %v4322_v34 = vpop.eup %4321  ;;  %v2401_v43 = vadd.f32 1.0, %v4320_v46 }
 0x775   :  { %v2407_v53 = vadd.f32 1.0, %v4322_v34  ;;  %v4324_v56 = vpop.eup %4323 }
 0x776   :  { %4327 = vrcp.f32 %v2401_v43  ;;  %v4326_v50 = vpop.eup %4325  ;;  %v2414_v3 = vadd.f32 1.0, %v4324_v56 }
 0x777   :  { %4329 = vrcp.f32 %v2407_v53 }
 0x778   :  { %4331 = vrcp.f32 %v2414_v3  ;;  %v4215_v3 = vld [vmem:[%s5580_s10] sm:$0xff]  }
 0x780   :  { %v4328_v36 = vpop.eup %4327 }
 0x781   :  { %v4330_v62 = vpop.eup %4329  ;;  %v2418_v1 = vmul.f32 %v4328_v36, %v4326_v50 }
 0x782   :  { %v2417_v42 = vmul.f32 %v4330_v62, %v5325_v45  ;;  %v4332_v6 = vpop.eup %4331 }
 0x784   :  { %v5371_v14 = vadd.f32 %v2418_v1, %v2417_v42 }
 0x786   :  { %4333 = vtanh.f32 %v5371_v14 }
 0x790   :  { %v4334_v39 = vpop.eup %4333 }
 0x791   :  { %v5374_v9 = vmul.f32 %v4334_v39, %v4332_v6  ;;  %v5613_v6 = vld [vmem:[#allocation11_spill] sm:$0xff] }
 0x793   :  { %v2431_v44 = vpack.c.bf16 %v5374_v9, %v5374_v9 }
 0x795   :  { %2657 = vmatmul.mubr.bf16.vlgmr.msra.gmra.mrb[60].mxu0 %v2431_v44  ;;  %2698 = vmatmul.mubr.bf16.vlgmr.msra.gmra.mrb[28].mxu1 %v2431_v44  ;;  %v5614_v44 = vld [vmem:[#allocation20_spill] sm:$0xff] }
 0x796   :  { %2937 = vmatpush1.bf16.msra.mxu0 %v5231_v60  ;;  %2978 = vmatpush1.bf16.msra.mxu1 %v5104_v16 }
 0x797   :  { %2938 = vmatprep.subr.bf16.mxu0 %v5238_v48  ;;  %2979 = vmatprep.subr.bf16.mxu1 %v5111_v18 }
 0x798   :  { %2968 = vmatprep.mubr.bf16.mxu0 %v5603_v41  ;;  %3009 = vmatprep.mubr.bf16.mxu1 %v5603_v41 }
 0x79a   :  { %2939 = vmatpush1.bf16.msra.mxu0 %v5243_v17  ;;  %2980 = vmatpush1.bf16.msra.mxu1 %v5116_v19  ;;  %v5609_v19 = vld [vmem:[#allocation9_spill] sm:$0xff] }
 0x79b   :  { %2940 = vmatprep.subr.bf16.mxu0 %v5250_v32  ;;  %2981 = vmatprep.subr.bf16.mxu1 %v5123_v20 }
 0x79e   :  { %2941 = vmatpush1.bf16.msra.mxu0 %v5255_v33  ;;  %2982 = vmatpush1.bf16.msra.mxu1 %v5128_v21  ;;  %v5610_v21 = vld [vmem:[#allocation18_spill] sm:$0xff] }
 0x79f   :  { %2942 = vmatprep.subr.bf16.mxu0 %v5262_v7  ;;  %2983 = vmatprep.subr.bf16.mxu1 %v5135_v22 }
 0x7a2   :  { %2943 = vmatpush1.bf16.msra.mxu0 %v5267_v35  ;;  %2984 = vmatpush1.bf16.msra.mxu1 %v5140_v23 }
 0x7a3   :  { %2944 = vmatprep.subr.bf16.mxu0 %v5274_v4  ;;  %2985 = vmatprep.subr.bf16.mxu1 %v5147_v61 }
 0x7a6   :  { %2945 = vmatpush1.bf16.msra.mxu0 %v5279_v55  ;;  %2986 = vmatpush1.bf16.msra.mxu1 %v5152_v24  ;;  %v5611_v24 = vld [vmem:[#allocation10_spill] sm:$0xff] }
 0x7a7   :  { %2946 = vmatprep.subr.bf16.mxu0 %v5285_v52  ;;  %2987 = vmatprep.subr.bf16.mxu1 %v5158_v57 }
 0x7aa   :  { %2947 = vmatpush1.bf16.msra.mxu0 %v5291_v40  ;;  %2988 = vmatpush1.bf16.msra.mxu1 %v5164_v25  ;;  %v5612_v25 = vld [vmem:[#allocation19_spill] sm:$0xff] }
 0x7ab   :  { %2948 = vmatprep.subr.bf16.mxu0 %v5297_v54  ;;  %2989 = vmatprep.subr.bf16.mxu1 %v5170_v26 }
 0x7ae   :  { %2949 = vmatpush1.bf16.msra.mxu0 %v5303_v63  ;;  %2990 = vmatpush1.bf16.msra.mxu1 %v5176_v27 }
 0x7af   :  { %2950 = vmatprep.subr.bf16.mxu0 %v5309_v2  ;;  %2991 = vmatprep.subr.bf16.mxu1 %v5182_v28 }
 0x7b2   :  { %2951 = vmatpush1.bf16.msra.mxu0 %v5315_v31  ;;  %2992 = vmatpush1.bf16.msra.mxu1 %v5188_v30 }
 0x7b3   :  { %3248 = vmatprep.subr.bf16.mxu0 %v5226_v29 }
 0x868   :  { %v2658_v16 = vpop.f32.mrb[60].mxu0  ;;  %v2699_v18 = vpop.f32.mrb[28].mxu1 }
 0x869   :  { %v2706_v20 = vadd.f32 %v2658_v16, %v5609_v19  ;;  %v2708_v22 = vadd.f32 %v2699_v18, %v5610_v21  ;;  %v2660_v23 = vpop.f32.mrb[61].mxu0  ;;  %v2701_v61 = vpop.f32.mrb[29].mxu1 }
 0x86a   :  { %v2707_v57 = vadd.f32 %v2660_v23, %v5611_v24  ;;  %v2709_v26 = vadd.f32 %v2701_v61, %v5612_v25  ;;  %v2662_v27 = vpop.f32.mrb[62].mxu0  ;;  %v2703_v28 = vpop.f32.mrb[30].mxu1 }
 0x86b   :  { %v3809_v45 = vmul.f32 -1.442695, %v2706_v20  ;;  %v2663_v11 = vpop.f32.mrb[63].mxu0  ;;  %v2704_v10 = vpop.f32.mrb[31].mxu1  ;;  %v5615_v20 = vld [vmem:[#allocation12_spill] sm:$0xff] }
 0x86c   :  { %v3810_v30 = vmul.f32 -1.442695, %v2707_v57  ;;  %v3811_v29 = vmul.f32 -1.442695, %v2709_v26 }
 0x86d   :  { %4335 = vpow2.f32 %v3809_v45 }
 0x86e   :  { %4337 = vpow2.f32 %v3810_v30 }
 0x86f   :  { %4339 = vpow2.f32 %v3811_v29 }
 0x870   :  { %4341 = vtanh.f32 %v2708_v22  ;;  %v5616_v22 = vld [vmem:[#allocation21_spill] sm:$0xff] }
 0x877   :  { %v4336_v47 = vpop.eup %4335 }
 0x878   :  { %v4338_v51 = vpop.eup %4337  ;;  %v2713_v49 = vadd.f32 1.0, %v4336_v47 }
 0x879   :  { %v2719_v15 = vadd.f32 1.0, %v4338_v51  ;;  %v4340_v37 = vpop.eup %4339 }
 0x87a   :  { %4343 = vrcp.f32 %v2713_v49  ;;  %v4342_v38 = vpop.eup %4341  ;;  %v2726_v43 = vadd.f32 1.0, %v4340_v37 }
 0x87b   :  { %4345 = vrcp.f32 %v2719_v15 }
 0x87c   :  { %4347 = vrcp.f32 %v2726_v43 }
 0x884   :  { %v4344_v13 = vpop.eup %4343 }
 0x885   :  { %v4346_v46 = vpop.eup %4345  ;;  %v2730_v34 = vmul.f32 %v4344_v13, %v4342_v38 }
 0x886   :  { %v2729_v53 = vmul.f32 %v4346_v46, %v5371_v14  ;;  %v4348_v50 = vpop.eup %4347 }
 0x888   :  { %v5416_v56 = vadd.f32 %v2730_v34, %v2729_v53 }
 0x88a   :  { %4349 = vtanh.f32 %v5416_v56 }
 0x894   :  { %v4350_v36 = vpop.eup %4349 }
 0x895   :  { %v5419_v62 = vmul.f32 %v4350_v36, %v4348_v50  ;;  %v4216_v50 = vld [vmem:[%s5580_s10 + $0x8] sm:$0xff]   ;;  %v3378_v36 = vpack.c.bf16 %v5075_v0, %v5030_v5  ;;  %v4219_v5 = vld [vmem:[%s5580_s10 + $0x20] sm:$0xff]  }
 0x896   :  { %v4220_v0 = vld [vmem:[%s5580_s10 + $0x28] sm:$0xff]  }
 0x897   :  { %v2743_v1 = vpack.c.bf16 %v5419_v62, %v5419_v62 }
 0x899   :  { %2969 = vmatmul.mubr.bf16.vlgmr.msra.gmra.mrb[64].mxu0 %v2743_v1  ;;  %3010 = vmatmul.mubr.bf16.vlgmr.msra.gmra.mrb[32].mxu1 %v2743_v1  ;;  %v4218_v1 = vld [vmem:[%s5580_s10 + $0x18] sm:$0xff]  }
 0x89a   :  { %3249 = vmatpush1.bf16.msra.mxu0 %v5231_v60  ;;  %3280 = vmatprep.mubr.bf16.mxu0 %v5603_v41  ;;  %v4191_v60 = vld [vmem:[%s5574_s9 + $0x8] ss:$16 sps:$4 sm:$0xff]  }
 0x89b   :  { %3250 = vmatprep.subr.bf16.mxu0 %v5238_v48  ;;  %3321 = vmatprep.mubr.bf16.mxu1 %v5603_v41  ;;  %v4193_v41 = vld [vmem:[%s5574_s9 + $0xc] ss:$16 sps:$4 sm:$0xff]  }
 0x89c   :  { %3289 = vmatprep.subr.bf16.mxu1 %v4193_v41  ;;  %v4196_v48 = vld [vmem:[%s5574_s9 + $0x2c] ss:$16 sps:$4 sm:$0xff]   ;;  %v4221_v41 = vld [vmem:[%s5580_s10 + $0x30] sm:$0xff]  }
 0x89d   :  { %3290 = vmatpush1.bf16.msra.mxu1 %v4191_v60  ;;  %v4222_v60 = vld [vmem:[%s5580_s10 + $0x38] sm:$0xff]  }
 0x89e   :  { %3251 = vmatpush1.bf16.msra.mxu0 %v5243_v17  ;;  %v4194_v17 = vld [vmem:[%s5574_s9 + $0x28] ss:$16 sps:$4 sm:$0xff]   ;;  %3291 = vmatprep.subr.bf16.mxu1 %v4196_v48  ;;  %v3379_v48 = vpack.c.bf16 %v5328_v59, %v5201_v12 }
 0x89f   :  { %3252 = vmatprep.subr.bf16.mxu0 %v5250_v32  ;;  %v4199_v32 = vld [vmem:[%s5574_s9 + $0x4c] ss:$16 sps:$4 sm:$0xff]  }
 0x8a1   :  { %3292 = vmatpush1.bf16.msra.mxu1 %v4194_v17  ;;  %v3380_v17 = vpack.c.bf16 %v5419_v62, %v5374_v9 }
 0x8a2   :  { %3253 = vmatpush1.bf16.msra.mxu0 %v5255_v33  ;;  %v4197_v33 = vld [vmem:[%s5574_s9 + $0x48] ss:$16 sps:$4 sm:$0xff]   ;;  %3293 = vmatprep.subr.bf16.mxu1 %v4199_v32 }
 0x8a3   :  { %3254 = vmatprep.subr.bf16.mxu0 %v5262_v7  ;;  %v4202_v7 = vld [vmem:[%s5574_s9 + $0x6c] ss:$16 sps:$4 sm:$0xff]  }
 0x8a5   :  { %3294 = vmatpush1.bf16.msra.mxu1 %v4197_v33 }
 0x8a6   :  { %3255 = vmatpush1.bf16.msra.mxu0 %v5267_v35  ;;  %v4200_v35 = vld [vmem:[%s5574_s9 + $0x68] ss:$16 sps:$4 sm:$0xff]   ;;  %3295 = vmatprep.subr.bf16.mxu1 %v4202_v7 }
 0x8a7   :  { %3256 = vmatprep.subr.bf16.mxu0 %v5274_v4  ;;  %v4205_v4 = vld [vmem:[%s5574_s9 + $0x8c] ss:$16 sps:$4 sm:$0xff]  }
 0x8a8   :  { %v5617_v7 = vld [vmem:[#allocation13_spill] sm:$0xff] }
 0x8a9   :  { %3296 = vmatpush1.bf16.msra.mxu1 %v4200_v35 }
 0x8aa   :  { %3257 = vmatpush1.bf16.msra.mxu0 %v5279_v55  ;;  %v4203_v55 = vld [vmem:[%s5574_s9 + $0x88] ss:$16 sps:$4 sm:$0xff]   ;;  %3297 = vmatprep.subr.bf16.mxu1 %v4205_v4 }
 0x8ab   :  { %3258 = vmatprep.subr.bf16.mxu0 %v5285_v52  ;;  %v4206_v52 = vld [vmem:[%s5574_s9 + $0xa8] ss:$16 sps:$4 sm:$0xff]  }
 0x8ad   :  { %3298 = vmatpush1.bf16.msra.mxu1 %v4203_v55 }
 0x8ae   :  { %3259 = vmatpush1.bf16.msra.mxu0 %v5291_v40  ;;  %v4208_v40 = vld [vmem:[%s5574_s9 + $0xac] ss:$16 sps:$4 sm:$0xff]  }
 0x8af   :  { %3260 = vmatprep.subr.bf16.mxu0 %v5297_v54  ;;  %v4211_v54 = vld [vmem:[%s5574_s9 + $0xcc] ss:$16 sps:$4 sm:$0xff]   ;;  %3299 = vmatprep.subr.bf16.mxu1 %v4208_v40  ;;  %v5618_v40 = vld [vmem:[#allocation14_spill] sm:$0xff] }
 0x8b1   :  { %3300 = vmatpush1.bf16.msra.mxu1 %v4206_v52 }
 0x8b2   :  { %3261 = vmatpush1.bf16.msra.mxu0 %v5303_v63  ;;  %v4209_v63 = vld [vmem:[%s5574_s9 + $0xc8] ss:$16 sps:$4 sm:$0xff]   ;;  %3301 = vmatprep.subr.bf16.mxu1 %v4211_v54 }
 0x8b3   :  { %3262 = vmatprep.subr.bf16.mxu0 %v5309_v2  ;;  %v4214_v2 = vld [vmem:[%s5574_s9 + $0xec] ss:$16 sps:$4 sm:$0xff]  }
 0x8b5   :  { %3302 = vmatpush1.bf16.msra.mxu1 %v4209_v63 }
 0x8b6   :  { %3263 = vmatpush1.bf16.msra.mxu0 %v5315_v31  ;;  %v4212_v31 = vld [vmem:[%s5574_s9 + $0xe8] ss:$16 sps:$4 sm:$0xff]   ;;  %3303 = vmatprep.subr.bf16.mxu1 %v4214_v2 }
 0x8b9   :  { %3304 = vmatpush1.bf16.msra.mxu1 %v4212_v31 }
 0x8ba   :  { %3974 = vmatprep.subr.bf16.mxu1 %v4215_v3 }
 0x96c   :  { %v2970_v42 = vpop.f32.mrb[64].mxu0  ;;  %v3011_v14 = vpop.f32.mrb[32].mxu1 }
 0x96d   :  { %v3018_v39 = vadd.f32 %v2970_v42, %v5613_v6  ;;  %v3020_v16 = vadd.f32 %v3011_v14, %v5614_v44  ;;  %v2972_v18 = vpop.f32.mrb[65].mxu0  ;;  %v3013_v19 = vpop.f32.mrb[33].mxu1 }
 0x96e   :  { %v3019_v21 = vadd.f32 %v2972_v18, %v5615_v20  ;;  %v3021_v23 = vadd.f32 %v3013_v19, %v5616_v22  ;;  %v2974_v61 = vpop.f32.mrb[66].mxu0  ;;  %v3015_v24 = vpop.f32.mrb[34].mxu1  ;;  %v4383_v22 = vld [vmem:[%s5578_s8] sm:$0x1f] }
 0x96f   :  { %v3844_v57 = vmul.f32 -1.442695, %v3018_v39  ;;  %v2975_v25 = vpop.f32.mrb[67].mxu0  ;;  %v3016_v26 = vpop.f32.mrb[35].mxu1  ;;  %v5619_v39 = vld [vmem:[#allocation6_spill] sm:$0xff] }
 0x970   :  { %v3845_v27 = vmul.f32 -1.442695, %v3019_v21  ;;  %v3846_v28 = vmul.f32 -1.442695, %v3021_v23  ;;  %v397_v44 = vsub.s32 4, %v5619_v39 }
 0x971   :  { %4351 = vpow2.f32 %v3844_v57 }
 0x972   :  { %4353 = vpow2.f32 %v3845_v27  ;;  %v398_v23 = vrot.slane %v4383_v22, %v397_v44 }
 0x973   :  { %4355 = vpow2.f32 %v3846_v28 }
 0x974   :  { %4357 = vtanh.f32 %v3020_v16 }
 0x97b   :  { %v4352_v45 = vpop.eup %4351 }
 0x97c   :  { %v4354_v11 = vpop.eup %4353  ;;  %v3025_v10 = vadd.f32 1.0, %v4352_v45 }
 0x97d   :  { %v3031_v30 = vadd.f32 1.0, %v4354_v11  ;;  %v4356_v29 = vpop.eup %4355 }
 0x97e   :  { %4359 = vrcp.f32 %v3025_v10  ;;  %v4358_v47 = vpop.eup %4357  ;;  %v3038_v37 = vadd.f32 1.0, %v4356_v29 }
 0x97f   :  { %4361 = vrcp.f32 %v3031_v30 }
 0x980   :  { %4363 = vrcp.f32 %v3038_v37 }
 0x988   :  { %v4360_v51 = vpop.eup %4359 }
 0x989   :  { %v4362_v49 = vpop.eup %4361  ;;  %v3042_v15 = vmul.f32 %v4360_v51, %v4358_v47 }
 0x98a   :  { %v3041_v38 = vmul.f32 %v4362_v49, %v5416_v56  ;;  %v4364_v46 = vpop.eup %4363  ;;  %v4217_v56 = vld [vmem:[%s5580_s10 + $0x10] sm:$0xff]  }
 0x98c   :  { %v5496_v13 = vadd.f32 %v3042_v15, %v3041_v38 }
 0x98e   :  { %4365 = vtanh.f32 %v5496_v13 }
 0x998   :  { %v4366_v34 = vpop.eup %4365 }
 0x999   :  { %v5499_v43 = vmul.f32 %v4366_v34, %v4364_v46 }
 0x99b   :  { %v3055_v53 = vpack.c.bf16 %v5499_v43, %v5499_v43 }
 0x99d   :  { %3281 = vmatmul.mubr.bf16.vlgmr.msra.gmra.mrb[68].mxu0 %v3055_v53  ;;  %3322 = vmatmul.mubr.bf16.vlgmr.msra.gmra.mrb[36].mxu1 %v3055_v53 }
 0x99e   :  { %3975 = vmatpush3.bf16.msra.mxu1 %v4215_v3  ;;  %3990 = vmatprep.mubr.bf16.mxu1 %v3378_v36 }
 0x99f   :  { %3976 = vmatprep.subr.bf16.mxu1 %v4216_v50 }
 0x9a2   :  { %3977 = vmatpush3.bf16.msra.mxu1 %v4216_v50 }
 0x9a3   :  { %3978 = vmatprep.subr.bf16.mxu1 %v4217_v56 }
 0x9a6   :  { %3979 = vmatpush3.bf16.msra.mxu1 %v4217_v56 }
 0x9a7   :  { %3980 = vmatprep.subr.bf16.mxu1 %v4218_v1 }
 0x9aa   :  { %3981 = vmatpush3.bf16.msra.mxu1 %v4218_v1 }
 0x9ab   :  { %3982 = vmatprep.subr.bf16.mxu1 %v4219_v5 }
 0x9ae   :  { %3983 = vmatpush3.bf16.msra.mxu1 %v4219_v5 }
 0x9af   :  { %3984 = vmatprep.subr.bf16.mxu1 %v4220_v0 }
 0x9b2   :  { %3985 = vmatpush3.bf16.msra.mxu1 %v4220_v0 }
 0x9b3   :  { %3986 = vmatprep.subr.bf16.mxu1 %v4221_v41 }
 0x9b6   :  { %3987 = vmatpush3.bf16.msra.mxu1 %v4221_v41 }
 0x9b7   :  { %3988 = vmatprep.subr.bf16.mxu1 %v4222_v60 }
 0x9ba   :  { %3989 = vmatpush3.bf16.msra.mxu1 %v4222_v60 }
 0x9bd   :  { %3991 = vmatmul.mubr.bf16.vlgmr.msra.gmra.mrb[0].mxu1 %v3379_v48 }
 0x9be   :  { %3994 = vmatprep.mubr.bf16.mxu1 %v3380_v17 }
 0xa70   :  { %v3282_v32 = vpop.f32.mrb[68].mxu0  ;;  %v3323_v33 = vpop.f32.mrb[36].mxu1 }
 0xa71   :  { %v3330_v35 = vadd.f32 %v3282_v32, %v5617_v7  ;;  %v3332_v4 = vadd.f32 %v3323_v33, %v5016_v8  ;;  %v3284_v55 = vpop.f32.mrb[69].mxu0  ;;  %v3325_v52 = vpop.f32.mrb[37].mxu1 }
 0xa72   :  { %v3331_v54 = vadd.f32 %v3284_v55, %v5618_v40  ;;  %v3333_v63 = vadd.f32 %v3325_v52, %v5018_v58  ;;  %v3286_v2 = vpop.f32.mrb[70].mxu0  ;;  %v3327_v31 = vpop.f32.mrb[38].mxu1 }
 0xa73   :  { %v3879_v12 = vmul.f32 -1.442695, %v3330_v35  ;;  %v3287_v59 = vpop.f32.mrb[71].mxu0  ;;  %v3328_v3 = vpop.f32.mrb[39].mxu1 }
 0xa74   :  { %v3880_v9 = vmul.f32 -1.442695, %v3331_v54  ;;  %v3881_v62 = vmul.f32 -1.442695, %v3333_v63 }
 0xa75   :  { %4367 = vpow2.f32 %v3879_v12 }
 0xa76   :  { %4369 = vpow2.f32 %v3880_v9 }
 0xa77   :  { %4371 = vpow2.f32 %v3881_v62 }
 0xa78   :  { %4373 = vtanh.f32 %v3332_v4 }
 0xa7f   :  { %v4368_v42 = vpop.eup %4367 }
 0xa80   :  { %v4370_v14 = vpop.eup %4369  ;;  %v3337_v6 = vadd.f32 1.0, %v4368_v42 }
 0xa81   :  { %v3343_v8 = vadd.f32 1.0, %v4370_v14  ;;  %v4372_v58 = vpop.eup %4371 }
 0xa82   :  { %4375 = vrcp.f32 %v3337_v6  ;;  %v4374_v16 = vpop.eup %4373  ;;  %v3350_v21 = vadd.f32 1.0, %v4372_v58 }
 0xa83   :  { %4377 = vrcp.f32 %v3343_v8 }
 0xa84   :  { %4379 = vrcp.f32 %v3350_v21 }
 0xa8c   :  { %v4376_v18 = vpop.eup %4375 }
 0xa8d   :  { %v4378_v19 = vpop.eup %4377  ;;  %v3354_v20 = vmul.f32 %v4376_v18, %v4374_v16 }
 0xa8e   :  { %v3353_v61 = vmul.f32 %v4378_v19, %v5496_v13  ;;  %v4380_v30 = vpop.eup %4379 }
 0xa90   :  { %v3355_v24 = vadd.f32 %v3354_v20, %v3353_v61  ;;  %v3992_v57 = vpop.f32.mrb[0].mxu1 }
 0xa91   :  { %v4000_v25 = vadd.f32 %v3992_v57, %v398_v23  ;;  %v3480_v26 = vpop.f32.mrb[1].mxu1 }
 0xa92   :  { %3531 = vst [vmem:[%s5581_s13] sm:$0xff] %v3355_v24  ;;  %v4003_v27 = vadd.f32 %v3480_v26, %v398_v23  ;;  %v3993_v28 = vpop.f32.mrb[2].mxu1  ;;  %4381 = vtanh.f32 %v3355_v24 }
 0xa93   :  { %3521 = vst [vmem:[%s5582_s11 + $0x10] sm:$0xff] %v4000_v25  ;;  %v4006_v45 = vadd.f32 %v3993_v28, %v398_v23  ;;  %v3483_v11 = vpop.f32.mrb[3].mxu1 }
 0xa94   :  { %3519 = vst [vmem:[%s5582_s11] sm:$0xff] %v4003_v27  ;;  %v4009_v10 = vadd.f32 %v3483_v11, %v398_v23 }
 0xa95   :  { %3522 = vst [vmem:[%s5582_s11 + $0x18] sm:$0xff] %v4006_v45 }
 0xa96   :  { %3520 = vst [vmem:[%s5582_s11 + $0x8] sm:$0xff] %v4009_v10 }
 0xa9c   :  { %v4382_v29 = vpop.eup %4381 }
 0xa9d   :  { %v3357_v47 = vmul.f32 %v4382_v29, %v4380_v30 }
 0xa9f   :  { %v3381_v51 = vpack.c.bf16 %v3357_v47, %v5499_v43  ;;  %3530 = vst [vmem:[%s5583_s12] sm:$0xff] %v3357_v47 }
 0xaa1   :  { %3995 = vmatmul.mubr.bf16.gmra.mrb[4].mxu1 %v3381_v51 }
 0xb74   :  { %v3996_v49 = vpop.f32.mrb[4].mxu1 }
 0xb75   :  { %v4012_v15 = vadd.f32 %v3996_v49, %v398_v23  ;;  %v3496_v37 = vpop.f32.mrb[5].mxu1 }
 0xb76   :  { %v4015_v38 = vadd.f32 %v3496_v37, %v398_v23  ;;  %v3997_v13 = vpop.f32.mrb[6].mxu1 }
 0xb77   :  { %3525 = vst [vmem:[%s5582_s11 + $0x30] sm:$0xff] %v4012_v15  ;;  %v4018_v46 = vadd.f32 %v3997_v13, %v398_v23  ;;  %v3499_v34 = vpop.f32.mrb[7].mxu1 }
 0xb78   :  { %3523 = vst [vmem:[%s5582_s11 + $0x20] sm:$0xff] %v4015_v38  ;;  %v4021_v43 = vadd.f32 %v3499_v34, %v398_v23 }
 0xb79   :  { %3526 = vst [vmem:[%s5582_s11 + $0x38] sm:$0xff] %v4018_v46 }
 0xb7a   :  { %3524 = vst [vmem:[%s5582_s11 + $0x28] sm:$0xff] %v4021_v43 }

</bundles_post_ra>
